<compile_context>
chip_gen: v5e
topology: v5e:2x2
jax: 0.10.0
libtpu: 0.0.40
codegen_flags: <defaults>
</compile_context>

<pallas_src>
import jax
import jax.numpy as jnp
from jax.experimental import pallas as pl
from jax.experimental.pallas import tpu as pltpu

# Synthetic stand-ins for global_define (not provided in the source repo).
G_NOISE_SIZE = 128   # global_define.G_NoiseSize
DATA_SIZE = 256      # global_define.DataSize
H1, H2, H3 = 256, 512, 256
BN_EPS = 1e-5

# Packed per-feature parameter layout (all offsets are multiples of 128 lanes).
_OFF_G1, _OFF_BE1 = 0, 256
_OFF_G2, _OFF_BE2 = 512, 1024
_OFF_G3, _OFF_BE3 = 1536, 1792
_OFF_B4 = 2048
_PACKED = 2304


def _bn_relu(h, gamma, beta, inv_b):
    """Training-mode BatchNorm1d (fused scale/shift) + ReLU, f32.

    Single reduction pass: sum and sum-of-squares together, var = E[x^2] - mean^2.
    """
    s1 = jnp.sum(h, axis=0, keepdims=True)
    s2 = jnp.sum(h * h, axis=0, keepdims=True)
    mean = s1 * inv_b
    var = jnp.maximum(s2 * inv_b - mean * mean, 0.0)   # biased variance, clamp fp rounding
    scale = gamma * jax.lax.rsqrt(var + BN_EPS)        # rsqrt -> EUP slot
    shift = beta - mean * scale
    return jnp.maximum(h * scale + shift, 0.0)


def generator_kernel(x_ref, w1_ref, w2_ref, w3_ref, w4_ref, p_ref, o_ref):
    inv_b = 1.0 / x_ref.shape[0]           # static at trace time
    p = p_ref[...]                         # (1, 2304) f32 packed per-feature params

    x = x_ref[...].astype(jnp.bfloat16)

    # fc1 -> BN -> ReLU   (fc1 bias omitted: exactly cancelled by BN mean subtraction)
    h = jnp.dot(x, w1_ref[...], preferred_element_type=jnp.float32)
    h = _bn_relu(h, p[:, _OFF_G1:_OFF_G1 + H1], p[:, _OFF_BE1:_OFF_BE1 + H1], inv_b)

    # fc2 -> BN -> ReLU
    h = jnp.dot(h.astype(jnp.bfloat16), w2_ref[...], preferred_element_type=jnp.float32)
    h = _bn_relu(h, p[:, _OFF_G2:_OFF_G2 + H2], p[:, _OFF_BE2:_OFF_BE2 + H2], inv_b)

    # fc3 -> BN -> ReLU
    h = jnp.dot(h.astype(jnp.bfloat16), w3_ref[...], preferred_element_type=jnp.float32)
    h = _bn_relu(h, p[:, _OFF_G3:_OFF_G3 + H3], p[:, _OFF_BE3:_OFF_BE3 + H3], inv_b)

    # fc4 (bias kept) -> sigmoid
    h = jnp.dot(h.astype(jnp.bfloat16), w4_ref[...], preferred_element_type=jnp.float32)
    h = h + p[:, _OFF_B4:_OFF_B4 + DATA_SIZE]
    # sigmoid = 1 / (1 + exp(-h)): exp and reciprocal both land on the (idle) EUP slot.
    sig = pl.reciprocal(1.0 + jnp.exp(-h), approx=True)
    o_ref[...] = jnp.clip(sig, 0.0, 1.0).astype(o_ref.dtype)   # keep strict [0, 1] range


def generator_forward(noise, params):
    """Full Generator forward pass in one Pallas kernel invocation.

    noise: (B, G_NOISE_SIZE) float32, B >= 2 (training-mode BN needs a batch).
    params: dict from init_params().
    """
    B = noise.shape[0]
    assert B >= 2, "training-mode BatchNorm degenerates at batch 1"

    args = (noise, params["w1"], params["w2"], params["w3"], params["w4"], params["packed"])
    vmem_spec = pl.BlockSpec(memory_space=pltpu.MemorySpace.VMEM)

    flops = 2 * B * (G_NOISE_SIZE * H1 + H1 * H2 + H2 * H3 + H3 * DATA_SIZE)
    weight_bytes = sum(int(params[f"w{i}"].size) for i in (1, 2, 3, 4)) * 2   # bf16
    bytes_accessed = (noise.size * 4) + weight_bytes + (_PACKED * 4) + (B * DATA_SIZE * 4)

    out = pl.pallas_call(
        generator_kernel,
        out_shape=jax.ShapeDtypeStruct((B, DATA_SIZE), jnp.float32),
        in_specs=[vmem_spec] * len(args),
        out_specs=vmem_spec,
        cost_estimate=pl.CostEstimate(
            flops=flops,
            transcendentals=B * DATA_SIZE,        # sigmoid exp
            bytes_accessed=bytes_accessed,
        ),
    )(*args)
    # x.view(-1, DataSize) is a no-op: output is already (B, DataSize).
    return out


def init_params(key, mean=0.0, std=0.02):
    """Mirror Generator.weight_init(mean, std): Linear weights ~ N(mean, std),
    Linear biases = 0, BN gamma = 1 / beta = 0.  Weights kept as (in, out) == weight.T
    in bf16; tiny per-feature vectors packed into one (1, 2304) f32 array."""
    dims = [(G_NOISE_SIZE, H1), (H1, H2), (H2, H3), (H3, DATA_SIZE)]
    keys = jax.random.split(key, len(dims))
    p = {}
    for i, ((din, dout), k) in enumerate(zip(dims, keys), start=1):
        w = mean + std * jax.random.normal(k, (din, dout), dtype=jnp.float32)
        p[f"w{i}"] = w.astype(jnp.bfloat16)

    packed = jnp.zeros((1, _PACKED), jnp.float32)
    # gammas = 1; betas and fc4 bias stay 0 (fc1-3 biases are dropped: cancelled by BN).
    packed = packed.at[:, _OFF_G1:_OFF_G1 + H1].set(1.0)
    packed = packed.at[:, _OFF_G2:_OFF_G2 + H2].set(1.0)
    packed = packed.at[:, _OFF_G3:_OFF_G3 + H3].set(1.0)
    p["packed"] = packed
    return p


if __name__ == "__main__":
    key = jax.random.PRNGKey(0)
    k_params, k_noise = jax.random.split(key)

    params = init_params(k_params, mean=0.0, std=0.02)
    batch = 8   # small demo batch (sublane-aligned); training-mode BN needs B >= 2
    noise = jax.random.normal(k_noise, (batch, G_NOISE_SIZE), dtype=jnp.float32)

    out = generator_forward(noise, params)
    out = jax.block_until_ready(out)

    assert out.shape == (batch, DATA_SIZE), out.shape
    assert bool(jnp.all(jnp.isfinite(out)))
    assert bool(jnp.all((out >= 0.0) & (out <= 1.0)))  # sigmoid range
    print("KERNEL_OK")
</pallas_src>

<mosaic_0001>
module attributes {stable_mosaic.version = 11 : i64} {
  func.func @generator_kernel(%arg0: memref<8x128xf32, #tpu.memory_space<vmem>>, %arg1: memref<128x256xbf16, #tpu.memory_space<vmem>>, %arg2: memref<256x512xbf16, #tpu.memory_space<vmem>>, %arg3: memref<512x256xbf16, #tpu.memory_space<vmem>>, %arg4: memref<256x256xbf16, #tpu.memory_space<vmem>>, %arg5: memref<1x2304xf32, #tpu.memory_space<vmem>>, %arg6: memref<8x256xf32, #tpu.memory_space<vmem>>) attributes {dimension_semantics = [], scalar_prefetch = 0 : i64, scratch_operands = 0 : i64, tpu.core_type = #tpu.core_type<tc>} {
    %c0 = arith.constant 0 : index
    %c0_0 = arith.constant 0 : index
    %0 = vector.load %arg5[%c0, %c0_0] : memref<1x2304xf32, #tpu.memory_space<vmem>>, vector<1x2304xf32>
    %c0_1 = arith.constant 0 : index
    %c0_2 = arith.constant 0 : index
    %1 = vector.load %arg0[%c0_1, %c0_2] : memref<8x128xf32, #tpu.memory_space<vmem>>, vector<8x128xf32>
    %2 = arith.truncf %1 : vector<8x128xf32> to vector<8x128xbf16>
    %c0_3 = arith.constant 0 : index
    %c0_4 = arith.constant 0 : index
    %3 = vector.load %arg1[%c0_3, %c0_4] : memref<128x256xbf16, #tpu.memory_space<vmem>>, vector<128x256xbf16>
    %cst = arith.constant dense<0.000000e+00> : vector<8x256xf32>
    %4 = tpu.matmul %2, %3, %cst {dimension_numbers = #tpu.dot_dimension_numbers<[1], [0], [0], [1], [0, 0, 1, 1], [], []>} : vector<8x128xbf16>, vector<128x256xbf16>, vector<8x256xf32> -> vector<8x256xf32>
    %5 = vector.extract_strided_slice %0 {offsets = [0, 0], sizes = [1, 256], strides = [1, 1]} : vector<1x2304xf32> to vector<1x256xf32>
    %6 = vector.extract_strided_slice %0 {offsets = [0, 256], sizes = [1, 256], strides = [1, 1]} : vector<1x2304xf32> to vector<1x256xf32>
    %cst_5 = arith.constant dense<0.000000e+00> : vector<256xf32>
    %7 = vector.multi_reduction <add>, %4, %cst_5 [0] : vector<8x256xf32> to vector<256xf32>
    %8 = vector.shape_cast %7 : vector<256xf32> to vector<1x256xf32>
    %9 = arith.mulf %4, %4 : vector<8x256xf32>
    %cst_6 = arith.constant dense<0.000000e+00> : vector<256xf32>
    %10 = vector.multi_reduction <add>, %9, %cst_6 [0] : vector<8x256xf32> to vector<256xf32>
    %11 = vector.shape_cast %10 : vector<256xf32> to vector<1x256xf32>
    %cst_7 = arith.constant 1.250000e-01 : f32
    %12 = vector.broadcast %cst_7 : f32 to vector<1x256xf32>
    %13 = arith.mulf %8, %12 : vector<1x256xf32>
    %cst_8 = arith.constant 1.250000e-01 : f32
    %14 = vector.broadcast %cst_8 : f32 to vector<1x256xf32>
    %15 = arith.mulf %11, %14 : vector<1x256xf32>
    %16 = arith.mulf %13, %13 : vector<1x256xf32>
    %17 = arith.subf %15, %16 : vector<1x256xf32>
    %cst_9 = arith.constant 0.000000e+00 : f32
    %18 = vector.broadcast %cst_9 : f32 to vector<1x256xf32>
    %19 = arith.maximumf %17, %18 : vector<1x256xf32>
    %cst_10 = arith.constant 9.99999974E-6 : f32
    %20 = vector.broadcast %cst_10 : f32 to vector<1x256xf32>
    %21 = arith.addf %19, %20 : vector<1x256xf32>
    %22 = math.rsqrt %21 : vector<1x256xf32>
    %23 = arith.mulf %5, %22 : vector<1x256xf32>
    %24 = arith.mulf %13, %23 : vector<1x256xf32>
    %25 = arith.subf %6, %24 : vector<1x256xf32>
    %26 = vector.broadcast %23 : vector<1x256xf32> to vector<8x256xf32>
    %27 = arith.mulf %4, %26 : vector<8x256xf32>
    %28 = vector.broadcast %25 : vector<1x256xf32> to vector<8x256xf32>
    %29 = arith.addf %27, %28 : vector<8x256xf32>
    %cst_11 = arith.constant 0.000000e+00 : f32
    %30 = vector.broadcast %cst_11 : f32 to vector<8x256xf32>
    %31 = arith.maximumf %29, %30 : vector<8x256xf32>
    %32 = arith.truncf %31 : vector<8x256xf32> to vector<8x256xbf16>
    %c0_12 = arith.constant 0 : index
    %c0_13 = arith.constant 0 : index
    %33 = vector.load %arg2[%c0_12, %c0_13] : memref<256x512xbf16, #tpu.memory_space<vmem>>, vector<256x512xbf16>
    %cst_14 = arith.constant dense<0.000000e+00> : vector<8x512xf32>
    %34 = tpu.matmul %32, %33, %cst_14 {dimension_numbers = #tpu.dot_dimension_numbers<[1], [0], [0], [1], [0, 0, 1, 1], [], []>} : vector<8x256xbf16>, vector<256x512xbf16>, vector<8x512xf32> -> vector<8x512xf32>
    %35 = vector.extract_strided_slice %0 {offsets = [0, 512], sizes = [1, 512], strides = [1, 1]} : vector<1x2304xf32> to vector<1x512xf32>
    %36 = vector.extract_strided_slice %0 {offsets = [0, 1024], sizes = [1, 512], strides = [1, 1]} : vector<1x2304xf32> to vector<1x512xf32>
    %cst_15 = arith.constant dense<0.000000e+00> : vector<512xf32>
    %37 = vector.multi_reduction <add>, %34, %cst_15 [0] : vector<8x512xf32> to vector<512xf32>
    %38 = vector.shape_cast %37 : vector<512xf32> to vector<1x512xf32>
    %39 = arith.mulf %34, %34 : vector<8x512xf32>
    %cst_16 = arith.constant dense<0.000000e+00> : vector<512xf32>
    %40 = vector.multi_reduction <add>, %39, %cst_16 [0] : vector<8x512xf32> to vector<512xf32>
    %41 = vector.shape_cast %40 : vector<512xf32> to vector<1x512xf32>
    %cst_17 = arith.constant 1.250000e-01 : f32
    %42 = vector.broadcast %cst_17 : f32 to vector<1x512xf32>
    %43 = arith.mulf %38, %42 : vector<1x512xf32>
    %cst_18 = arith.constant 1.250000e-01 : f32
    %44 = vector.broadcast %cst_18 : f32 to vector<1x512xf32>
    %45 = arith.mulf %41, %44 : vector<1x512xf32>
    %46 = arith.mulf %43, %43 : vector<1x512xf32>
    %47 = arith.subf %45, %46 : vector<1x512xf32>
    %cst_19 = arith.constant 0.000000e+00 : f32
    %48 = vector.broadcast %cst_19 : f32 to vector<1x512xf32>
    %49 = arith.maximumf %47, %48 : vector<1x512xf32>
    %cst_20 = arith.constant 9.99999974E-6 : f32
    %50 = vector.broadcast %cst_20 : f32 to vector<1x512xf32>
    %51 = arith.addf %49, %50 : vector<1x512xf32>
    %52 = math.rsqrt %51 : vector<1x512xf32>
    %53 = arith.mulf %35, %52 : vector<1x512xf32>
    %54 = arith.mulf %43, %53 : vector<1x512xf32>
    %55 = arith.subf %36, %54 : vector<1x512xf32>
    %56 = vector.broadcast %53 : vector<1x512xf32> to vector<8x512xf32>
    %57 = arith.mulf %34, %56 : vector<8x512xf32>
    %58 = vector.broadcast %55 : vector<1x512xf32> to vector<8x512xf32>
    %59 = arith.addf %57, %58 : vector<8x512xf32>
    %cst_21 = arith.constant 0.000000e+00 : f32
    %60 = vector.broadcast %cst_21 : f32 to vector<8x512xf32>
    %61 = arith.maximumf %59, %60 : vector<8x512xf32>
    %62 = arith.truncf %61 : vector<8x512xf32> to vector<8x512xbf16>
    %c0_22 = arith.constant 0 : index
    %c0_23 = arith.constant 0 : index
    %63 = vector.load %arg3[%c0_22, %c0_23] : memref<512x256xbf16, #tpu.memory_space<vmem>>, vector<512x256xbf16>
    %cst_24 = arith.constant dense<0.000000e+00> : vector<8x256xf32>
    %64 = tpu.matmul %62, %63, %cst_24 {dimension_numbers = #tpu.dot_dimension_numbers<[1], [0], [0], [1], [0, 0, 1, 1], [], []>} : vector<8x512xbf16>, vector<512x256xbf16>, vector<8x256xf32> -> vector<8x256xf32>
    %65 = vector.extract_strided_slice %0 {offsets = [0, 1536], sizes = [1, 256], strides = [1, 1]} : vector<1x2304xf32> to vector<1x256xf32>
    %66 = vector.extract_strided_slice %0 {offsets = [0, 1792], sizes = [1, 256], strides = [1, 1]} : vector<1x2304xf32> to vector<1x256xf32>
    %cst_25 = arith.constant dense<0.000000e+00> : vector<256xf32>
    %67 = vector.multi_reduction <add>, %64, %cst_25 [0] : vector<8x256xf32> to vector<256xf32>
    %68 = vector.shape_cast %67 : vector<256xf32> to vector<1x256xf32>
    %69 = arith.mulf %64, %64 : vector<8x256xf32>
    %cst_26 = arith.constant dense<0.000000e+00> : vector<256xf32>
    %70 = vector.multi_reduction <add>, %69, %cst_26 [0] : vector<8x256xf32> to vector<256xf32>
    %71 = vector.shape_cast %70 : vector<256xf32> to vector<1x256xf32>
    %cst_27 = arith.constant 1.250000e-01 : f32
    %72 = vector.broadcast %cst_27 : f32 to vector<1x256xf32>
    %73 = arith.mulf %68, %72 : vector<1x256xf32>
    %cst_28 = arith.constant 1.250000e-01 : f32
    %74 = vector.broadcast %cst_28 : f32 to vector<1x256xf32>
    %75 = arith.mulf %71, %74 : vector<1x256xf32>
    %76 = arith.mulf %73, %73 : vector<1x256xf32>
    %77 = arith.subf %75, %76 : vector<1x256xf32>
    %cst_29 = arith.constant 0.000000e+00 : f32
    %78 = vector.broadcast %cst_29 : f32 to vector<1x256xf32>
    %79 = arith.maximumf %77, %78 : vector<1x256xf32>
    %cst_30 = arith.constant 9.99999974E-6 : f32
    %80 = vector.broadcast %cst_30 : f32 to vector<1x256xf32>
    %81 = arith.addf %79, %80 : vector<1x256xf32>
    %82 = math.rsqrt %81 : vector<1x256xf32>
    %83 = arith.mulf %65, %82 : vector<1x256xf32>
    %84 = arith.mulf %73, %83 : vector<1x256xf32>
    %85 = arith.subf %66, %84 : vector<1x256xf32>
    %86 = vector.broadcast %83 : vector<1x256xf32> to vector<8x256xf32>
    %87 = arith.mulf %64, %86 : vector<8x256xf32>
    %88 = vector.broadcast %85 : vector<1x256xf32> to vector<8x256xf32>
    %89 = arith.addf %87, %88 : vector<8x256xf32>
    %cst_31 = arith.constant 0.000000e+00 : f32
    %90 = vector.broadcast %cst_31 : f32 to vector<8x256xf32>
    %91 = arith.maximumf %89, %90 : vector<8x256xf32>
    %92 = arith.truncf %91 : vector<8x256xf32> to vector<8x256xbf16>
    %c0_32 = arith.constant 0 : index
    %c0_33 = arith.constant 0 : index
    %93 = vector.load %arg4[%c0_32, %c0_33] : memref<256x256xbf16, #tpu.memory_space<vmem>>, vector<256x256xbf16>
    %cst_34 = arith.constant dense<0.000000e+00> : vector<8x256xf32>
    %94 = tpu.matmul %92, %93, %cst_34 {dimension_numbers = #tpu.dot_dimension_numbers<[1], [0], [0], [1], [0, 0, 1, 1], [], []>} : vector<8x256xbf16>, vector<256x256xbf16>, vector<8x256xf32> -> vector<8x256xf32>
    %95 = vector.extract_strided_slice %0 {offsets = [0, 2048], sizes = [1, 256], strides = [1, 1]} : vector<1x2304xf32> to vector<1x256xf32>
    %96 = vector.broadcast %95 : vector<1x256xf32> to vector<8x256xf32>
    %97 = arith.addf %94, %96 : vector<8x256xf32>
    %cst_35 = arith.constant 0.000000e+00 : f32
    %98 = vector.broadcast %cst_35 : f32 to vector<8x256xf32>
    %99 = arith.subf %98, %97 : vector<8x256xf32>
    %100 = math.exp %99 : vector<8x256xf32>
    %cst_36 = arith.constant 1.000000e+00 : f32
    %101 = vector.broadcast %cst_36 : f32 to vector<8x256xf32>
    %102 = arith.addf %101, %100 : vector<8x256xf32>
    %103 = tpu.reciprocal %102 {approx = true} : vector<8x256xf32> -> vector<8x256xf32>
    %cst_37 = arith.constant 0.000000e+00 : f32
    %cst_38 = arith.constant 1.000000e+00 : f32
    %104 = vector.broadcast %cst_37 : f32 to vector<8x256xf32>
    %105 = arith.maximumf %104, %103 : vector<8x256xf32>
    %106 = vector.broadcast %cst_38 : f32 to vector<8x256xf32>
    %107 = arith.minimumf %106, %105 : vector<8x256xf32>
    %c0_39 = arith.constant 0 : index
    %c0_40 = arith.constant 0 : index
    %108 = vector.load %arg6[%c0_39, %c0_40] : memref<8x256xf32, #tpu.memory_space<vmem>>, vector<8x256xf32>
    tpu.vector_store %arg6[%c0_39, %c0_40], %107 {strides = array<i32>} : memref<8x256xf32, #tpu.memory_space<vmem>>, vector<8x256xf32>,
    return
  }
}

</mosaic_0001>

<bundles_post_ra>
// kernel: tpu_custom_call.1
= control target key start
LH: loop header
LB: loop body
LE: loop exit
PB: predicated region body
PF: predicated region fallthrough
CT: control target
= control target key end

     0   :  { %11 = vsyncpa [#allocation3], 0  ;;  %s3271_s0 = inlined_call_operand.hbm [shape: f32[8,128], index: 0, kind: input, shape index: {}]   ;;  %s3272_s1 = inlined_call_operand.hbm [shape: bf16[128,256], index: 1, kind: input, shape index: {}]   ;;  %s3273_s2 = inlined_call_operand.hbm [shape: bf16[256,512], index: 2, kind: input, shape index: {}]   ;;  %s3274_s3 = inlined_call_operand.hbm [shape: bf16[512,256], index: 3, kind: input, shape index: {}]   ;;  %s3275_s4 = inlined_call_operand.hbm [shape: bf16[256,256], index: 4, kind: input, shape index: {}]   ;;  %s3276_s5 = inlined_call_operand.hbm [shape: f32[1,2304], index: 5, kind: input, shape index: {}]   ;;  %s3277_s6 = inlined_call_operand.hbm [shape: f32[8,256], index: 6, kind: output, shape index: {}]  }
   0x1   :  { %12 = vsyncpa [#allocation6], 0 }
   0x2   :  { %13 = vsyncpa [#allocation9], 0 }
   0x3   :  { %14 = vsyncpa [#allocation12], 0  ;;  %s31_s23 = sshll.u32 %s3272_s1, 4  ;;  %s32_s23 = int_to_ptr.hbm [resolvable:$true] %s31_s23 }
   0x4   :  { %15 = vsyncpa [#allocation4], 0  ;;  %s2966_s24 = smov [#allocation5]   ;;  %s57_s28 = sshll.u32 %s3274_s3, 4  ;;  %s58_s28 = int_to_ptr.hbm [resolvable:$true] %s57_s28 }
   0x5   :  { %s33_s25 = sshll.u32 %s2966_s24, 4  ;;  %s2967_s29 = smov 128   ;;  %s34_s25 = int_to_ptr.vmem [resolvable:$true] %s33_s25 }
   0x6   :  { %s2968_s30 = smov 8   ;;  %s2969_s7 = smov [#allocation8]  }
   0x7   :  { %39 = dma.hbm_to_vmem [thread:$0]  %s32_s23, 2048, %s34_s25, [#allocation6], %s2967_s29, %s2967_s29, %s2968_s30  }
   0x8   :  { %s59_s8 = sshll.u32 %s2969_s7, 4  ;;  %s21_s10 = sshll.u32 %s3271_s0, 4  ;;  %s60_s8 = int_to_ptr.vmem [resolvable:$true] %s59_s8  ;;  %s22_s10 = int_to_ptr.hbm [resolvable:$true] %s21_s10 }
   0x9   :  { %65 = dma.hbm_to_vmem [thread:$0]  %s58_s28, 8192, %s60_s8, [#allocation9], %s2967_s29, %s2967_s29, %s2968_s30  }
   0xa   :  { %s44_s12 = sshll.u32 %s3273_s2, 4  ;;  %s2970_s13 = smov [#allocation2]   ;;  %s45_s12 = int_to_ptr.hbm [resolvable:$true] %s44_s12 }
   0xb   :  { %s23_s14 = sshll.u32 %s2970_s13, 4  ;;  %s2971_s15 = smov [#allocation7]   ;;  %s24_s14 = int_to_ptr.vmem [resolvable:$true] %s23_s14 }
   0xc   :  { %26 = dma.hbm_to_vmem [thread:$0]  %s22_s10, 128, %s24_s14, [#allocation3]  }
   0xd   :  { %s46_s16 = sshll.u32 %s2971_s15, 4  ;;  %s2972_s17 = smov 256   ;;  %s47_s16 = int_to_ptr.vmem [resolvable:$true] %s46_s16 }
   0xe   :  { %s2973_s0 = smov 16   ;;  %s70_s20 = sshll.u32 %s3275_s4, 4  ;;  %s71_s20 = int_to_ptr.hbm [resolvable:$true] %s70_s20 }
   0xf   :  { %52 = dma.hbm_to_vmem [thread:$0]  %s45_s12, 8192, %s47_s16, [#allocation6], %s2972_s17, %s2972_s17, %s2973_s0  }
  0x10   :  { %s2974_s21 = smov [#allocation10]   ;;  %s84_s24 = sshll.u32 %s3276_s5, 4  ;;  %s85_s24 = int_to_ptr.hbm [resolvable:$true] %s84_s24 }
  0x11   :  { %s72_s22 = sshll.u32 %s2974_s21, 4  ;;  %s2975_s25 = smov [#allocation11]   ;;  %s73_s22 = int_to_ptr.vmem [resolvable:$true] %s72_s22 }
  0x12   :  { %78 = dma.hbm_to_vmem [thread:$0]  %s71_s20, 4096, %s73_s22, [#allocation9], %s2967_s29, %s2967_s29, %s2968_s30  }
  0x13   :  { %s86_s26 = sshll.u32 %s2975_s25, 4  ;;  %s87_s26 = int_to_ptr.vmem [resolvable:$true] %s86_s26 }
  0x14   :  { %89 = dma.hbm_to_vmem [thread:$0]  %s85_s24, 288, %s87_s26, [#allocation12]  }
  0x15   :  { %2956 = dma.done.wait [#allocation3], 128  }
  0x16   :  { %2957 = vsyncadd [#allocation3], 4294967168 }
  0x17   :  { %2958 = dma.done.wait [#allocation6], 10240  }
  0x18   :  { %2959 = vsyncadd [#allocation6], 4294957056 }
  0x19   :  { %2960 = dma.done.wait [#allocation9], 12288  }
  0x1a   :  { %2961 = vsyncadd [#allocation9], 4294955008 }
  0x1b   :  { %2962 = dma.done.wait [#allocation12], 288  }
  0x1c   :  { %2963 = vsyncadd [#allocation12], 4294967008  ;;  %v1931_v0 = vld [vmem:[#allocation5 + $0x70] sm:$0xf]  ;;  %v2592_v1 = vld [vmem:[#allocation5 + $0x74] sm:$0xf0] }
  0x1d   :  { %v2591_v2 = vld [vmem:[#allocation5 + $0x74] sm:$0xf]  ;;  %v1932_v3 = vor.u32 %v2592_v1, %v1931_v0  ;;  %v1933_v4 = vld [vmem:[#allocation5 + $0x78] sm:$0xf0]  ;;  %v1923_v5 = vld [vmem:[#allocation5 + $0x60] sm:$0xf] }
  0x1e   :  { %v2590_v6 = vld [vmem:[#allocation5 + $0x64] sm:$0xf0]  ;;  %v1936_v7 = vor.u32 %v2591_v2, %v1933_v4  ;;  %v2589_v8 = vld [vmem:[#allocation5 + $0x64] sm:$0xf]  ;;  %v1925_v9 = vld [vmem:[#allocation5 + $0x68] sm:$0xf0] }
  0x1f   :  { %215 = vmatpush.bf16.msra.mxu0 %v1932_v3  ;;  %v1924_v10 = vor.u32 %v2590_v6, %v1923_v5  ;;  %v1928_v11 = vor.u32 %v2589_v8, %v1925_v9  ;;  %v1915_v12 = vld [vmem:[#allocation5 + $0x50] sm:$0xf]  ;;  %v2588_v13 = vld [vmem:[#allocation5 + $0x54] sm:$0xf0]  ;;  %v2587_v14 = vld [vmem:[#allocation5 + $0x54] sm:$0xf] }
  0x20   :  { %228 = vmatpush.bf16.msra.mxu1 %v1936_v7  ;;  %v1917_v15 = vld [vmem:[#allocation5 + $0x58] sm:$0xf0]  ;;  %v1916_v16 = vor.u32 %v2588_v13, %v1915_v12  ;;  %v1907_v18 = vld [vmem:[#allocation5 + $0x40] sm:$0xf]  ;;  %v2586_v19 = vld [vmem:[#allocation5 + $0x44] sm:$0xf0] }
  0x21   :  { %v1920_v17 = vor.u32 %v2587_v14, %v1917_v15  ;;  %v2585_v20 = vld [vmem:[#allocation5 + $0x44] sm:$0xf]  ;;  %v1909_v21 = vld [vmem:[#allocation5 + $0x48] sm:$0xf0]  ;;  %v1908_v22 = vor.u32 %v2586_v19, %v1907_v18  ;;  %v1899_v24 = vld [vmem:[#allocation5 + $0x30] sm:$0xf] }
  0x22   :  { %v1912_v23 = vor.u32 %v2585_v20, %v1909_v21  ;;  %v2584_v25 = vld [vmem:[#allocation5 + $0x34] sm:$0xf0]  ;;  %v2583_v26 = vld [vmem:[#allocation5 + $0x34] sm:$0xf]  ;;  %v1901_v27 = vld [vmem:[#allocation5 + $0x38] sm:$0xf0] }
  0x23   :  { %216 = vmatpush.bf16.msra.mxu0 %v1924_v10  ;;  %v1900_v28 = vor.u32 %v2584_v25, %v1899_v24  ;;  %v1904_v29 = vor.u32 %v2583_v26, %v1901_v27  ;;  %v1891_v30 = vld [vmem:[#allocation5 + $0x20] sm:$0xf]  ;;  %v2582_v31 = vld [vmem:[#allocation5 + $0x24] sm:$0xf0]  ;;  %v2581_v32 = vld [vmem:[#allocation5 + $0x24] sm:$0xf] }
  0x24   :  { %229 = vmatpush.bf16.msra.mxu1 %v1928_v11  ;;  %v1893_v33 = vld [vmem:[#allocation5 + $0x28] sm:$0xf0]  ;;  %v1892_v34 = vor.u32 %v2582_v31, %v1891_v30  ;;  %v1883_v36 = vld [vmem:[#allocation5 + $0x10] sm:$0xf]  ;;  %v2580_v37 = vld [vmem:[#allocation5 + $0x14] sm:$0xf0] }
  0x25   :  { %v1896_v35 = vor.u32 %v2581_v32, %v1893_v33  ;;  %v2579_v38 = vld [vmem:[#allocation5 + $0x14] sm:$0xf]  ;;  %v1885_v39 = vld [vmem:[#allocation5 + $0x18] sm:$0xf0]  ;;  %v1884_v40 = vor.u32 %v2580_v37, %v1883_v36  ;;  %v1875_v42 = vld [vmem:[#allocation5] sm:$0xf] }
  0x26   :  { %v1888_v41 = vor.u32 %v2579_v38, %v1885_v39  ;;  %v2578_v43 = vld [vmem:[#allocation5 + $0x4] sm:$0xf0]  ;;  %v2577_v44 = vld [vmem:[#allocation5 + $0x4] sm:$0xf]  ;;  %v1877_v45 = vld [vmem:[#allocation5 + $0x8] sm:$0xf0] }
  0x27   :  { %217 = vmatpush.bf16.msra.mxu0 %v1916_v16  ;;  %v1876_v46 = vor.u32 %v2578_v43, %v1875_v42  ;;  %v117_v47 = vld [vmem:[#allocation2] sm:$0xff]  ;;  %v1880_v48 = vor.u32 %v2577_v44, %v1877_v45  ;;  %v2051_v50 = vld [vmem:[#allocation7 + $0xe0] sm:$0xf]  ;;  %v2623_v51 = vld [vmem:[#allocation7 + $0xec] sm:$0xf0]  ;;  %vm302_vm5 = vcmask 1040384  }
  0x28   :  { %230 = vmatpush.bf16.msra.mxu1 %v1920_v17  ;;  %v118_v49 = vpack.c.bf16 %v117_v47, %v117_v47  ;;  %v2179_v52 = vld [vmem:[#allocation7 + $0x1e0] sm:$0xf]  ;;  %v2052_v53 = vor.u32 %v2623_v51, %v2051_v50  ;;  %v2655_v54 = vld [vmem:[#allocation7 + $0x1ec] sm:$0xf0]  ;;  %v2621_v55 = vld [vmem:[#allocation7 + $0xe4] sm:$0xf] }
  0x29   :  { %v2053_v56 = vld [vmem:[#allocation7 + $0xf0] sm:$0xf0]  ;;  %v2180_v57 = vor.u32 %v2655_v54, %v2179_v52  ;;  %v2653_v59 = vld [vmem:[#allocation7 + $0x1e4] sm:$0xf]  ;;  %v2035_v62 = vld [vmem:[#allocation7 + $0xc0] sm:$0xf] }
  0x2a   :  { %v2056_v58 = vor.u32 %v2621_v55, %v2053_v56  ;;  %v2181_v60 = vld [vmem:[#allocation7 + $0x1f0] sm:$0xf0]  ;;  %719 = vmatpush.bf16.msra.mxu2 %v2052_v53  ;;  %v2619_v63 = vld [vmem:[#allocation7 + $0xcc] sm:$0xf0]  ;;  %v2163_v0 = vld [vmem:[#allocation7 + $0x1c0] sm:$0xf] }
  0x2b   :  { %218 = vmatpush.bf16.msra.mxu0 %v1908_v22  ;;  %v2184_v61 = vor.u32 %v2653_v59, %v2181_v60  ;;  %732 = vmatpush.bf16.msra.mxu3 %v2180_v57  ;;  %v2036_v1 = vor.u32 %v2619_v63, %v2035_v62  ;;  %v2651_v2 = vld [vmem:[#allocation7 + $0x1cc] sm:$0xf0]  ;;  %v2617_v3 = vld [vmem:[#allocation7 + $0xc4] sm:$0xf]  ;;  %v2037_v4 = vld [vmem:[#allocation7 + $0xd0] sm:$0xf0] }
  0x2c   :  { %231 = vmatpush.bf16.msra.mxu1 %v1912_v23  ;;  %v2164_v5 = vor.u32 %v2651_v2, %v2163_v0  ;;  %v2040_v6 = vor.u32 %v2617_v3, %v2037_v4  ;;  %v2649_v7 = vld [vmem:[#allocation7 + $0x1c4] sm:$0xf]  ;;  %v2165_v8 = vld [vmem:[#allocation7 + $0x1d0] sm:$0xf0]  ;;  %v2019_v10 = vld [vmem:[#allocation7 + $0xa0] sm:$0xf] }
  0x2d   :  { %v2168_v9 = vor.u32 %v2649_v7, %v2165_v8  ;;  %v2615_v11 = vld [vmem:[#allocation7 + $0xac] sm:$0xf0]  ;;  %v2147_v12 = vld [vmem:[#allocation7 + $0x1a0] sm:$0xf]  ;;  %v2613_v15 = vld [vmem:[#allocation7 + $0xa4] sm:$0xf] }
  0x2e   :  { %720 = vmatpush.bf16.msra.mxu2 %v2036_v1  ;;  %v2020_v13 = vor.u32 %v2615_v11, %v2019_v10  ;;  %v2647_v14 = vld [vmem:[#allocation7 + $0x1ac] sm:$0xf0]  ;;  %v2021_v16 = vld [vmem:[#allocation7 + $0xb0] sm:$0xf0]  ;;  %v2645_v19 = vld [vmem:[#allocation7 + $0x1a4] sm:$0xf] }
  0x2f   :  { %219 = vmatpush.bf16.msra.mxu0 %v1900_v28  ;;  %733 = vmatpush.bf16.msra.mxu3 %v2164_v5  ;;  %v2148_v17 = vor.u32 %v2647_v14, %v2147_v12  ;;  %v2024_v18 = vor.u32 %v2613_v15, %v2021_v16  ;;  %v2149_v20 = vld [vmem:[#allocation7 + $0x1b0] sm:$0xf0]  ;;  %v2003_v22 = vld [vmem:[#allocation7 + $0x80] sm:$0xf]  ;;  %v2611_v23 = vld [vmem:[#allocation7 + $0x8c] sm:$0xf0] }
  0x30   :  { %232 = vmatpush.bf16.msra.mxu1 %v1904_v29  ;;  %v2152_v21 = vor.u32 %v2645_v19, %v2149_v20  ;;  %v2131_v24 = vld [vmem:[#allocation7 + $0x180] sm:$0xf]  ;;  %v2004_v25 = vor.u32 %v2611_v23, %v2003_v22  ;;  %v2643_v26 = vld [vmem:[#allocation7 + $0x18c] sm:$0xf0]  ;;  %v2609_v27 = vld [vmem:[#allocation7 + $0x84] sm:$0xf] }
  0x31   :  { %v2132_v28 = vor.u32 %v2643_v26, %v2131_v24  ;;  %v2005_v29 = vld [vmem:[#allocation7 + $0x90] sm:$0xf0]  ;;  %v2641_v30 = vld [vmem:[#allocation7 + $0x184] sm:$0xf]  ;;  %v1987_v38 = vld [vmem:[#allocation7 + $0x60] sm:$0xf] }
  0x32   :  { %721 = vmatpush.bf16.msra.mxu2 %v2020_v13  ;;  %v2133_v31 = vld [vmem:[#allocation7 + $0x190] sm:$0xf0]  ;;  %v2008_v33 = vor.u32 %v2609_v27, %v2005_v29  ;;  %v2607_v39 = vld [vmem:[#allocation7 + $0x6c] sm:$0xf0]  ;;  %v2115_v43 = vld [vmem:[#allocation7 + $0x160] sm:$0xf] }
  0x33   :  { %220 = vmatpush.bf16.msra.mxu0 %v1892_v34  ;;  %734 = vmatpush.bf16.msra.mxu3 %v2148_v17  ;;  %v2136_v34 = vor.u32 %v2641_v30, %v2133_v31  ;;  %v1988_v42 = vor.u32 %v2607_v39, %v1987_v38  ;;  %v2639_v44 = vld [vmem:[#allocation7 + $0x16c] sm:$0xf0]  ;;  %v2637_v53 = vld [vmem:[#allocation7 + $0x164] sm:$0xf]  ;;  %v2117_v54 = vld [vmem:[#allocation7 + $0x170] sm:$0xf0] }
  0x34   :  { %233 = vmatpush.bf16.msra.mxu1 %v1896_v35  ;;  %v2116_v47 = vor.u32 %v2639_v44, %v2115_v43  ;;  %v2120_v57 = vor.u32 %v2637_v53, %v2117_v54  ;;  %v2603_v59 = vld [vmem:[#allocation7 + $0x4c] sm:$0xf0]  ;;  %v2099_v63 = vld [vmem:[#allocation7 + $0x140] sm:$0xf]  ;;  %v2601_v4 = vld [vmem:[#allocation7 + $0x44] sm:$0xf] }
  0x35   :  { %v2635_v0 = vld [vmem:[#allocation7 + $0x14c] sm:$0xf0]  ;;  %v1973_v5 = vld [vmem:[#allocation7 + $0x50] sm:$0xf0]  ;;  %v2633_v10 = vld [vmem:[#allocation7 + $0x144] sm:$0xf] }
  0x36   :  { %722 = vmatpush.bf16.msra.mxu2 %v2004_v25  ;;  %v2100_v3 = vor.u32 %v2635_v0, %v2099_v63  ;;  %v2101_v11 = vld [vmem:[#allocation7 + $0x150] sm:$0xf0]  ;;  %v1955_v16 = vld [vmem:[#allocation7 + $0x20] sm:$0xf]  ;;  %v2599_v17 = vld [vmem:[#allocation7 + $0x2c] sm:$0xf0] }
  0x37   :  { %221 = vmatpush.bf16.msra.mxu0 %v1884_v40  ;;  %735 = vmatpush.bf16.msra.mxu3 %v2132_v28  ;;  %v2104_v15 = vor.u32 %v2633_v10, %v2101_v11  ;;  %v1956_v20 = vor.u32 %v2599_v17, %v1955_v16  ;;  %v2631_v22 = vld [vmem:[#allocation7 + $0x12c] sm:$0xf0]  ;;  %v2597_v26 = vld [vmem:[#allocation7 + $0x24] sm:$0xf]  ;;  %v1957_v27 = vld [vmem:[#allocation7 + $0x30] sm:$0xf0] }
  0x38   :  { %234 = vmatpush.bf16.msra.mxu1 %v1888_v41  ;;  %v1960_v30 = vor.u32 %v2597_v26, %v1957_v27  ;;  %v2629_v31 = vld [vmem:[#allocation7 + $0x124] sm:$0xf]  ;;  %v1939_v38 = vld [vmem:[#allocation7] sm:$0xf]  ;;  %v2595_v39 = vld [vmem:[#allocation7 + $0xc] sm:$0xf0] }
  0x39   :  { %v2067_v43 = vld [vmem:[#allocation7 + $0x100] sm:$0xf]  ;;  %v2627_v44 = vld [vmem:[#allocation7 + $0x10c] sm:$0xf0]  ;;  %v2625_v53 = vld [vmem:[#allocation7 + $0x104] sm:$0xf] }
  0x3a   :  { %723 = vmatpush.bf16.msra.mxu2 %v1988_v42  ;;  %v1940_v42 = vor.u32 %v2595_v39, %v1939_v38  ;;  %v2069_v54 = vld [vmem:[#allocation7 + $0x110] sm:$0xf0]  ;;  %v2622_v63 = vld [vmem:[#allocation7 + $0xec] sm:$0xf]  ;;  %v2620_v10 = vld [vmem:[#allocation7 + $0xd4] sm:$0xf0] }
  0x3b   :  { %222 = vmatpush.bf16.msra.mxu0 %v1876_v46  ;;  %736 = vmatpush.bf16.msra.mxu3 %v2116_v47  ;;  %v2068_v47 = vor.u32 %v2627_v44, %v2067_v43  ;;  %v2171_v11 = vld [vmem:[#allocation7 + $0x1c8] sm:$0xf]  ;;  %v2045_v17 = vld [vmem:[#allocation7 + $0xd8] sm:$0xf0]  ;;  %v2648_v26 = vld [vmem:[#allocation7 + $0x1b4] sm:$0xf0] }
  0x3c   :  { %235 = vmatpush.bf16.msra.mxu1 %v1880_v48  ;;  %v2605_v48 = vld [vmem:[#allocation7 + $0x64] sm:$0xf]  ;;  %v2614_v27 = vld [vmem:[#allocation7 + $0xac] sm:$0xf]  ;;  %v2612_v38 = vld [vmem:[#allocation7 + $0x94] sm:$0xf0] }
  0x3d   :  { %v2139_v39 = vld [vmem:[#allocation7 + $0x188] sm:$0xf]  ;;  %v2610_v43 = vld [vmem:[#allocation7 + $0x8c] sm:$0xf]  ;;  %v2013_v44 = vld [vmem:[#allocation7 + $0x98] sm:$0xf0] }
  0x3e   :  { %223 = vmatmul.bf16.vlgmr.msra.gmra.mxu0 %v118_v49  ;;  %vm949_vm14 = vcmask 1042434   ;;  %s2976_s4 = smov [#allocation13]   ;;  %s1860_s29 = sshll.u32 %s3277_s6, 4  ;;  %s1861_s29 = int_to_ptr.hbm [resolvable:$true] %s1860_s29 }
  0x3f   :  { %236 = vmatmul.bf16.vlgmr.msra.gmra.mxu1 %v118_v49  ;;  %745 = vmatpush.bf16.msrb.mxu0 %v2056_v58  ;;  %v1989_v49 = vld [vmem:[#allocation7 + $0x70] sm:$0xf0]  ;;  %v1971_v58 = vld [vmem:[#allocation7 + $0x40] sm:$0xf]  ;;  %s1858_s5 = sshll.u32 %s2976_s4, 4  ;;  %s1859_s5 = int_to_ptr.vmem [resolvable:$true] %s1858_s5 }
  0x40   :  { %758 = vmatpush.bf16.msrb.mxu1 %v2184_v61  ;;  %v1992_v52 = vor.u32 %v2605_v48, %v1989_v49  ;;  %v1972_v62 = vor.u32 %v2603_v59, %v1971_v58  ;;  %737 = vmatpush.bf16.msra.mxu3 %v2100_v3  ;;  %v2593_v48 = vld [vmem:[#allocation7 + $0x4] sm:$0xf]  ;;  %v1941_v49 = vld [vmem:[#allocation7 + $0x10] sm:$0xf0]  ;;  %v2624_v58 = vld [vmem:[#allocation7 + $0xf4] sm:$0xf0] }
  0x41   :  { %v2654_v3 = vld [vmem:[#allocation7 + $0x1ec] sm:$0xf] }
  0x42   :  { %724 = vmatpush.bf16.msra.mxu2 %v1972_v62  ;;  %v2656_v62 = vld [vmem:[#allocation7 + $0x1f4] sm:$0xf0] }
  0x43   :  { %746 = vmatpush.bf16.msrb.mxu0 %v2040_v6 }
  0x44   :  { %759 = vmatpush.bf16.msrb.mxu1 %v2168_v9  ;;  %v1976_v9 = vor.u32 %v2601_v4, %v1973_v5 }
  0x46   :  { %725 = vmatpush.bf16.msra.mxu2 %v1956_v20 }
  0x47   :  { %747 = vmatpush.bf16.msrb.mxu0 %v2024_v18 }
  0x48   :  { %760 = vmatpush.bf16.msrb.mxu1 %v2152_v21  ;;  %v2083_v21 = vld [vmem:[#allocation7 + $0x120] sm:$0xf] }
  0x49   :  { %v2084_v25 = vor.u32 %v2631_v22, %v2083_v21  ;;  %v2027_v22 = vld [vmem:[#allocation7 + $0xa8] sm:$0xf] }
  0x4a   :  { %726 = vmatpush.bf16.msra.mxu2 %v1940_v42  ;;  %v2644_v42 = vld [vmem:[#allocation7 + $0x194] sm:$0xf0] }
  0x4b   :  { %748 = vmatpush.bf16.msrb.mxu0 %v2008_v33  ;;  %v2085_v33 = vld [vmem:[#allocation7 + $0x130] sm:$0xf0]  ;;  %738 = vmatpush.bf16.msra.mxu3 %v2084_v25 }
  0x4c   :  { %761 = vmatpush.bf16.msrb.mxu1 %v2136_v34 }
  0x4f   :  { %749 = vmatpush.bf16.msrb.mxu0 %v1992_v52  ;;  %v1944_v52 = vor.u32 %v2593_v48, %v1941_v49  ;;  %739 = vmatpush.bf16.msra.mxu3 %v2068_v47  ;;  %v2642_v47 = vld [vmem:[#allocation7 + $0x18c] sm:$0xf]  ;;  %v2141_v48 = vld [vmem:[#allocation7 + $0x198] sm:$0xf0] }
  0x50   :  { %762 = vmatpush.bf16.msrb.mxu1 %v2120_v57  ;;  %v2059_v57 = vld [vmem:[#allocation7 + $0xe8] sm:$0xf] }
  0x53   :  { %750 = vmatpush.bf16.msrb.mxu0 %v1976_v9 }
  0x54   :  { %763 = vmatpush.bf16.msrb.mxu1 %v2104_v15  ;;  %v2618_v15 = vld [vmem:[#allocation7 + $0xcc] sm:$0xf] }
  0x55   :  { %v2048_v20 = vor.u32 %v2618_v15, %v2045_v17 }
  0x57   :  { %751 = vmatpush.bf16.msrb.mxu0 %v1960_v30 }
  0x5b   :  { %752 = vmatpush.bf16.msrb.mxu0 %v1944_v52 }
  0xbb   :  { %v3039_v32 = vpop.f32.mrf.mxu0 }
  0xbc   :  { %v241_v35 = vrot.slane %v3039_v32, 4  ;;  %v253_v36 = vmul.f32 %v3039_v32, %v3039_v32  ;;  %v3044_v37 = vpop.f32.mrf.mxu1 }
  0xbd   :  { %v247_v40 = vrot.slane %v3044_v37, 4  ;;  %v254_v41 = vmul.f32 %v3044_v37, %v3044_v37 }
  0xbe   :  { %v242_v45 = vadd.f32 %v241_v35, %v3039_v32  ;;  %v255_v46 = vrot.slane %v253_v36, 4 }
  0xbf   :  { %v248_v50 = vadd.f32 %v247_v40, %v3044_v37  ;;  %v261_v51 = vrot.slane %v254_v41, 4 }
  0xc0   :  { %v243_v55 = vrot.slane %v242_v45, 2  ;;  %v256_v56 = vadd.f32 %v255_v46, %v253_v36  ;;  %v2088_v36 = vor.u32 %v2629_v31, %v2085_v33  ;;  %v2646_v31 = vld [vmem:[#allocation7 + $0x1ac] sm:$0xf]  ;;  %v2157_v33 = vld [vmem:[#allocation7 + $0x1b8] sm:$0xf0] }
  0xc1   :  { %v249_v60 = vrot.slane %v248_v50, 2  ;;  %v262_v61 = vadd.f32 %v261_v51, %v254_v41 }
  0xc2   :  { %v244_v1 = vadd.f32 %v243_v55, %v242_v45  ;;  %v257_v2 = vrot.slane %v256_v56, 2  ;;  %764 = vmatpush.bf16.msrb.mxu1 %v2088_v36  ;;  %v2011_v36 = vld [vmem:[#allocation7 + $0x88] sm:$0xf] }
  0xc3   :  { %v250_v6 = vadd.f32 %v249_v60, %v248_v50  ;;  %v263_v7 = vrot.slane %v262_v61, 2  ;;  %v226_v8 = vpop.f32.mrf.mxu0  ;;  %v2060_v60 = vor.u32 %v2624_v58, %v2059_v57  ;;  %v2123_v58 = vld [vmem:[#allocation7 + $0x168] sm:$0xf] }
  0xc4   :  { %v245_v12 = vrot.slane %v244_v1, 1  ;;  %v258_v13 = vadd.f32 %v257_v2, %v256_v56  ;;  %v239_v14 = vpop.f32.mrf.mxu1  ;;  %v2072_v56 = vor.u32 %v2625_v53, %v2069_v54  ;;  %v2061_v2 = vld [vmem:[#allocation7 + $0xf8] sm:$0xf0]  ;;  %v2144_v53 = vor.u32 %v2642_v47, %v2141_v48  ;;  %v1995_v54 = vld [vmem:[#allocation7 + $0x68] sm:$0xf] }
  0xc5   :  { %v251_v18 = vrot.slane %v250_v6, 1  ;;  %v264_v19 = vadd.f32 %v263_v7, %v262_v61  ;;  %v2187_v61 = vld [vmem:[#allocation7 + $0x1e8] sm:$0xf]  ;;  %771 = vmatpush.bf16.msrb.mxu2 %v2060_v60  ;;  %v2064_v5 = vor.u32 %v2622_v63, %v2061_v2  ;;  %v2652_v14 = vld [vmem:[#allocation7 + $0x1d4] sm:$0xf0] }
  0xc6   :  { %v246_v23 = vadd.f32 %v245_v12, %v244_v1  ;;  %v259_v24 = vrot.slane %v258_v13, 1  ;;  %765 = vmatpush.bf16.msrb.mxu1 %v2072_v56  ;;  %v2188_v1 = vor.u32 %v2656_v62, %v2187_v61  ;;  %v2043_v7 = vld [vmem:[#allocation7 + $0xc8] sm:$0xf]  ;;  %v2172_v16 = vor.u32 %v2652_v14, %v2171_v11  ;;  %v2606_v62 = vld [vmem:[#allocation7 + $0x6c] sm:$0xf] }
  0xc7   :  { %v252_v28 = vadd.f32 %v251_v18, %v250_v6  ;;  %v265_v29 = vrot.slane %v264_v19, 1  ;;  %v2189_v6 = vld [vmem:[#allocation7 + $0x1f8] sm:$0xf0]  ;;  %797 = vmatpush.bf16.msra.mxu0 %v2064_v5  ;;  %v2650_v18 = vld [vmem:[#allocation7 + $0x1cc] sm:$0xf] }
  0xc8   :  { %v260_v34 = vadd.f32 %v259_v24, %v258_v13  ;;  %v3051_v35 = vmul.f32 0.125, %v246_v23  ;;  %784 = vmatpush.bf16.msrb.mxu3 %v2188_v1  ;;  %v2192_v9 = vor.u32 %v2654_v3, %v2189_v6  ;;  %v2044_v13 = vor.u32 %v2620_v10, %v2043_v7  ;;  %v2616_v23 = vld [vmem:[#allocation7 + $0xb4] sm:$0xf0]  ;;  %v2155_v24 = vld [vmem:[#allocation7 + $0x1a8] sm:$0xf] }
  0xc9   :  { %v266_v40 = vadd.f32 %v265_v29, %v264_v19  ;;  %v3053_v41 = vmul.f32 0.125, %v252_v28  ;;  %v2173_v19 = vld [vmem:[#allocation7 + $0x1d8] sm:$0xf0]  ;;  %v2028_v25 = vor.u32 %v2616_v23, %v2027_v22  ;;  %v2156_v29 = vor.u32 %v2648_v26, %v2155_v24  ;;  %v2604_v7 = vld [vmem:[#allocation7 + $0x54] sm:$0xf0] }
  0xca   :  { %v269_v45 = vmul.f32 0.125, %v260_v34  ;;  %v271_v46 = vmul.f32 %v3051_v35, %v3051_v35  ;;  %810 = vmatpush.bf16.msra.mxu1 %v2192_v9  ;;  %772 = vmatpush.bf16.msrb.mxu2 %v2044_v13  ;;  %v2176_v21 = vor.u32 %v2650_v18, %v2173_v19  ;;  %v2029_v28 = vld [vmem:[#allocation7 + $0xb8] sm:$0xf0]  ;;  %v2160_v34 = vor.u32 %v2646_v31, %v2157_v33  ;;  %v2107_v9 = vld [vmem:[#allocation7 + $0x148] sm:$0xf] }
  0xcb   :  { %v270_v50 = vmul.f32 0.125, %v266_v40  ;;  %v272_v51 = vmul.f32 %v3053_v41, %v3053_v41  ;;  %798 = vmatpush.bf16.msra.mxu0 %v2048_v20  ;;  %v2032_v30 = vor.u32 %v2614_v27, %v2029_v28  ;;  %v2012_v40 = vor.u32 %v2612_v38, %v2011_v36  ;;  %v1997_v63 = vld [vmem:[#allocation7 + $0x78] sm:$0xf0]  ;;  %v2636_v13 = vld [vmem:[#allocation7 + $0x154] sm:$0xf0] }
  0xcc   :  { %v273_v55 = vsub.f32 %v269_v45, %v271_v46  ;;  %785 = vmatpush.bf16.msrb.mxu3 %v2172_v16  ;;  %v2140_v46 = vor.u32 %v2644_v42, %v2139_v39  ;;  %v2000_v2 = vor.u32 %v2606_v62, %v1997_v63  ;;  %v2125_v3 = vld [vmem:[#allocation7 + $0x178] sm:$0xf0]  ;;  %v2602_v14 = vld [vmem:[#allocation7 + $0x4c] sm:$0xf]  ;;  %v2108_v17 = vor.u32 %v2636_v13, %v2107_v9  ;;  %v1963_v22 = vld [vmem:[#allocation7 + $0x28] sm:$0xf] }
  0xcd   :  { %v274_v59 = vsub.f32 %v270_v50, %v272_v51  ;;  %v2016_v51 = vor.u32 %v2610_v43, %v2013_v44  ;;  %v1981_v18 = vld [vmem:[#allocation7 + $0x58] sm:$0xf0]  ;;  %v2634_v19 = vld [vmem:[#allocation7 + $0x14c] sm:$0xf]  ;;  %v2091_v26 = vld [vmem:[#allocation7 + $0x128] sm:$0xf] }
  0xce   :  { %v275_v0 = vmax.f32 %v273_v55, 0.0  ;;  %811 = vmatpush.bf16.msra.mxu1 %v2176_v21  ;;  %773 = vmatpush.bf16.msrb.mxu2 %v2028_v25  ;;  %v2608_v55 = vld [vmem:[#allocation7 + $0x74] sm:$0xf0]  ;;  %v1984_v20 = vor.u32 %v2602_v14, %v1981_v18  ;;  %v2109_v21 = vld [vmem:[#allocation7 + $0x158] sm:$0xf0] }
  0xcf   :  { %v276_v4 = vmax.f32 %v274_v59, 0.0  ;;  %799 = vmatpush.bf16.msra.mxu0 %v2032_v30  ;;  %v1996_v57 = vor.u32 %v2608_v55, %v1995_v54  ;;  %v2640_v59 = vld [vmem:[#allocation7 + $0x174] sm:$0xf0]  ;;  %v2112_v25 = vor.u32 %v2634_v19, %v2109_v21  ;;  %v2598_v28 = vld [vmem:[#allocation7 + $0x2c] sm:$0xf] }
  0xd0   :  { %v3059_v8 = vadd.f32 1e-05, %v275_v0  ;;  %786 = vmatpush.bf16.msrb.mxu3 %v2156_v29  ;;  %v2124_v61 = vor.u32 %v2640_v59, %v2123_v58  ;;  %v2638_v0 = vld [vmem:[#allocation7 + $0x16c] sm:$0xf]  ;;  %v2632_v27 = vld [vmem:[#allocation7 + $0x134] sm:$0xf0] }
  0xd1   :  { %v3061_v12 = vadd.f32 1e-05, %v276_v4  ;;  %v1979_v4 = vld [vmem:[#allocation7 + $0x48] sm:$0xf]  ;;  %v2128_v6 = vor.u32 %v2638_v0, %v2125_v3  ;;  %v1965_v30 = vld [vmem:[#allocation7 + $0x38] sm:$0xf0]  ;;  %v2092_v38 = vor.u32 %v2632_v27, %v2091_v26 }
  0xd2   :  { %2764 = vrsqrt.f32 %v3059_v8  ;;  %812 = vmatpush.bf16.msra.mxu1 %v2160_v34  ;;  %774 = vmatpush.bf16.msrb.mxu2 %v2012_v40  ;;  %v1980_v11 = vor.u32 %v2604_v7, %v1979_v4  ;;  %v2630_v31 = vld [vmem:[#allocation7 + $0x12c] sm:$0xf]  ;;  %v2093_v33 = vld [vmem:[#allocation7 + $0x138] sm:$0xf0]  ;;  %v3086_v34 = vld [vmem:[#allocation11] sm:$0xff]  ;;  %vm285_vm4 = vweird.f32 %v3059_v8  ;;  %v1968_v43 = vor.u32 %v2598_v28, %v1965_v30 }
  0xd3   :  { %2766 = vrsqrt.f32 %v3061_v12  ;;  %800 = vmatpush.bf16.msra.mxu0 %v2016_v51  ;;  %vm295_vm1 = vweird.f32 %v3061_v12  ;;  %v1947_v39 = vld [vmem:[#allocation7 + $0x8] sm:$0xf]  ;;  %v2596_v40 = vld [vmem:[#allocation7 + $0x14] sm:$0xf0]  ;;  %v2594_v48 = vld [vmem:[#allocation7 + $0xc] sm:$0xf] }
  0xd4   :  { %787 = vmatpush.bf16.msrb.mxu3 %v2140_v46  ;;  %v2075_v44 = vld [vmem:[#allocation7 + $0x108] sm:$0xf]  ;;  %v2628_v46 = vld [vmem:[#allocation7 + $0x114] sm:$0xf0]  ;;  %v1948_v51 = vor.u32 %v2596_v40, %v1947_v39  ;;  %v2251_v28 = vld [vmem:[#allocation8 + $0x70] sm:$0xf] }
  0xd5   :  { %v2076_v55 = vor.u32 %v2628_v46, %v2075_v44  ;;  %v2704_v44 = vld [vmem:[#allocation8 + $0x174] sm:$0xf0] }
  0xd6   :  { %813 = vmatpush.bf16.msra.mxu1 %v2144_v53  ;;  %775 = vmatpush.bf16.msrb.mxu2 %v1996_v57  ;;  %v2077_v53 = vld [vmem:[#allocation7 + $0x118] sm:$0xf0] }
  0xd7   :  { %801 = vmatpush.bf16.msra.mxu0 %v2000_v2 }
  0xd8   :  { %v3065_v45 = vpop.eup %2764  ;;  %788 = vmatpush.bf16.msrb.mxu3 %v2124_v61 }
  0xd9   :  { %v3067_v49 = vpop.eup %2766  ;;  %v280_v50 = vmul.f32 %v3065_v45, %v3059_v8  ;;  %vm286_vm3 = vweird.f32 %v3065_v45  ;;  %v2096_v8 = vor.u32 %v2630_v31, %v2093_v33 }
  0xda   :  { %v290_v52 = vmul.f32 %v3067_v49, %v3061_v12  ;;  %vm296_vm0 = vweird.f32 %v3067_v49  ;;  %v2600_v12 = vld [vmem:[#allocation7 + $0x34] sm:$0xf0]  ;;  %814 = vmatpush.bf16.msra.mxu1 %v2128_v6  ;;  %776 = vmatpush.bf16.msrb.mxu2 %v1980_v11  ;;  %vm287_vm6 = vmor %vm285_vm4, %vm286_vm3  ;;  %vm951_vm4 = vcmask 1041408  }
  0xdb   :  { %v281_v56 = vmul.f32 %v3065_v45, %v280_v50  ;;  %vm3079_vm2 = vmor %vm295_vm1, %vm296_vm0  ;;  %v1964_v29 = vor.u32 %v2600_v12, %v1963_v22  ;;  %802 = vmatpush.bf16.msra.mxu0 %v1984_v20  ;;  %v1949_v50 = vld [vmem:[#allocation7 + $0x18] sm:$0xf0] }
  0xdc   :  { %v291_v60 = vmul.f32 %v3067_v49, %v290_v52  ;;  %789 = vmatpush.bf16.msrb.mxu3 %v2108_v17  ;;  %v2626_v52 = vld [vmem:[#allocation7 + $0x10c] sm:$0xf] }
  0xdd   :  { %v282_v1 = vmul.f32 0.5, %v281_v56  ;;  %v1952_v56 = vor.u32 %v2594_v48, %v1949_v50 }
  0xde   :  { %v292_v5 = vmul.f32 0.5, %v291_v60  ;;  %815 = vmatpush.bf16.msra.mxu1 %v2112_v25  ;;  %777 = vmatpush.bf16.msrb.mxu2 %v1964_v29  ;;  %v314_v60 = vrot.slane %v3086_v34, 2  ;;  %v2672_v29 = vld [vmem:[#allocation8 + $0x74] sm:$0xf0] }
  0xdf   :  { %v283_v10 = vsub.f32 1.5, %v282_v1  ;;  %803 = vmatpush.bf16.msra.mxu0 %v1968_v43  ;;  %v2252_v33 = vor.u32 %v2672_v29, %v2251_v28  ;;  %v2379_v43 = vld [vmem:[#allocation8 + $0x170] sm:$0xf] }
  0xe0   :  { %v293_v15 = vsub.f32 1.5, %v292_v5  ;;  %790 = vmatpush.bf16.msrb.mxu3 %v2092_v38  ;;  %v2688_v38 = vld [vmem:[#allocation8 + $0xf4] sm:$0xf0]  ;;  %v2380_v50 = vor.u32 %v2704_v44, %v2379_v43  ;;  %v2666_v43 = vld [vmem:[#allocation8 + $0x44] sm:$0xf0] }
  0xe1   :  { %v284_v23 = vmul.f32 %v3065_v45, %v283_v10 }
  0xe2   :  { %v294_v24 = vmul.f32 %v3067_v49, %v293_v15  ;;  %816 = vmatpush.bf16.msra.mxu1 %v2096_v8  ;;  %778 = vmatpush.bf16.msrb.mxu2 %v1948_v51  ;;  %v2720_v51 = vld [vmem:[#allocation8 + $0x1f4] sm:$0xf0] }
  0xe3   :  { %v288_v47 = vsel %vm287_vm6, %v3065_v45, %v284_v23  ;;  %v2080_v45 = vor.u32 %v2626_v52, %v2077_v53  ;;  %804 = vmatpush.bf16.msra.mxu0 %v1952_v56  ;;  %v2670_v56 = vld [vmem:[#allocation8 + $0x64] sm:$0xf0] }
  0xe4   :  { %v298_v36 = vsel %vm3079_vm2, %v3067_v49, %v294_v24  ;;  %791 = vmatpush.bf16.msrb.mxu3 %v2076_v55  ;;  %v2243_v55 = vld [vmem:[#allocation8 + $0x60] sm:$0xf] }
  0xe5   :  { %v301_v42 = vrot.slane %v298_v36, 7  ;;  %v2315_v36 = vld [vmem:[#allocation8 + $0xf0] sm:$0xf] }
  0xe6   :  { %817 = vmatpush.bf16.msra.mxu1 %v2080_v45  ;;  %v2244_v45 = vor.u32 %v2670_v56, %v2243_v55  ;;  %v2355_v55 = vld [vmem:[#allocation8 + $0x140] sm:$0xf] }
  0xe7   :  { %v303_v49 = vsel %vm302_vm5, %v288_v47, %v301_v42  ;;  %v2316_v42 = vor.u32 %v2688_v38, %v2315_v36 }
  0xe8   :  { %v305_v54 = vmul.f32 %v303_v49, %v3086_v34  ;;  %v2443_v49 = vld [vmem:[#allocation8 + $0x1f0] sm:$0xf] }
  0xea   :  { %v307_v57 = vperm.slane %v305_v54, 0  ;;  %v308_v58 = vperm.slane %v305_v54, 1  ;;  %v2444_v54 = vor.u32 %v2720_v51, %v2443_v49 }
  0xec   :  { %v312_v59 = vmul.f32 %v308_v58, %v3053_v41  ;;  %v311_v61 = vmul.f32 %v307_v57, %v3051_v35  ;;  %v323_v1 = vmul.f32 %v308_v58, %v3044_v37  ;;  %v322_v3 = vmul.f32 %v307_v57, %v3039_v32 }
  0xee   :  { %v318_v62 = vrot.slane %v312_v59, 7  ;;  %v2307_v59 = vld [vmem:[#allocation8 + $0xe0] sm:$0xf] }
  0xf0   :  { %v319_v63 = vsel %vm302_vm5, %v311_v61, %v318_v62 }
  0xf1   :  { %v321_v0 = vsub.f32 %v314_v60, %v319_v63  ;;  %v2686_v60 = vld [vmem:[#allocation8 + $0xe4] sm:$0xf0] }
  0xf3   :  { %v326_v2 = vperm.slane %v321_v0, 1  ;;  %v325_v4 = vperm.slane %v321_v0, 0 }
  0xf5   :  { %v330_v5 = vadd.f32 %v326_v2, %v323_v1  ;;  %v329_v6 = vadd.f32 %v325_v4, %v322_v3  ;;  %v2308_v1 = vor.u32 %v2686_v60, %v2307_v59  ;;  %v2371_v2 = vld [vmem:[#allocation8 + $0x160] sm:$0xf]  ;;  %v2702_v3 = vld [vmem:[#allocation8 + $0x164] sm:$0xf0] }
  0xf6   :  { %v2419_v59 = vld [vmem:[#allocation8 + $0x1c0] sm:$0xf] }
  0xf7   :  { %v331_v41 = vmax.f32 %v329_v6, 0.0  ;;  %v332_v7 = vmax.f32 %v330_v5, 0.0 }
  0xf9   :  { %v333_v9 = vpack.c.bf16 %v331_v41, %v331_v41  ;;  %v334_v10 = vpack.c.bf16 %v332_v7, %v332_v7  ;;  %v2372_v41 = vor.u32 %v2702_v3, %v2371_v2  ;;  %v2435_v7 = vld [vmem:[#allocation8 + $0x1e0] sm:$0xf] }
  0xfb   :  { %727 = vmatmul.bf16.vlgmr.msra.gmra.mxu2 %v333_v9  ;;  %740 = vmatmul.bf16.vlgmr.msra.gmra.mxu3 %v334_v10 }
  0xfc   :  { %753 = vmatmul.bf16.vlgmr.msrb.gmra.mxu0 %v333_v9  ;;  %766 = vmatmul.bf16.vlgmr.msrb.gmra.mxu1 %v334_v10 }
  0xfd   :  { %1389 = vmatpush.bf16.msra.mxu2 %v2252_v33  ;;  %1402 = vmatpush.bf16.msra.mxu3 %v2316_v42  ;;  %v2716_v33 = vld [vmem:[#allocation8 + $0x1d4] sm:$0xf0]  ;;  %v2227_v42 = vld [vmem:[#allocation8 + $0x40] sm:$0xf] }
  0xfe   :  { %1415 = vmatpush.bf16.msrb.mxu0 %v2380_v50  ;;  %1428 = vmatpush.bf16.msrb.mxu1 %v2444_v54  ;;  %v2682_v54 = vld [vmem:[#allocation8 + $0xc4] sm:$0xf0] }
 0x101   :  { %1390 = vmatpush.bf16.msra.mxu2 %v2244_v45  ;;  %1403 = vmatpush.bf16.msra.mxu3 %v2308_v1  ;;  %v2698_v45 = vld [vmem:[#allocation8 + $0x144] sm:$0xf0]  ;;  %v2219_v1 = vld [vmem:[#allocation8 + $0x30] sm:$0xf] }
 0x102   :  { %1416 = vmatpush.bf16.msrb.mxu0 %v2372_v41  ;;  %v2664_v41 = vld [vmem:[#allocation8 + $0x34] sm:$0xf0] }
 0x10b   :  { %779 = vmatmul.bf16.vlgmr.msrb.gmra.mxu2 %v333_v9  ;;  %792 = vmatmul.bf16.vlgmr.msrb.gmra.mxu3 %v334_v10 }
 0x10c   :  { %805 = vmatmul.bf16.vlgmr.msra.gmra.mxu0 %v333_v9  ;;  %818 = vmatmul.bf16.vlgmr.msra.gmra.mxu1 %v334_v10  ;;  %v2718_v9 = vld [vmem:[#allocation8 + $0x1e4] sm:$0xf0] }
 0x179   :  { %v754_v35 = vpop.f32.mrf.mxu0  ;;  %v767_v37 = vpop.f32.mrf.mxu1 }
 0x17a   :  { %v3103_v11 = vadd.f32 %v767_v37, %v754_v35  ;;  %v2436_v37 = vor.u32 %v2718_v9, %v2435_v7  ;;  %v2283_v7 = vld [vmem:[#allocation8 + $0xb0] sm:$0xf] }
 0x17c   :  { %v829_v32 = vrot.slane %v3103_v11, 4  ;;  %v848_v13 = vmul.f32 %v3103_v11, %v3103_v11  ;;  %1429 = vmatpush.bf16.msrb.mxu1 %v2436_v37  ;;  %v2220_v37 = vor.u32 %v2664_v41, %v2219_v1 }
 0x17e   :  { %v830_v14 = vadd.f32 %v829_v32, %v3103_v11  ;;  %v857_v15 = vrot.slane %v848_v13, 4  ;;  %v728_v16 = vpop.f32.mrf.mxu2  ;;  %v741_v17 = vpop.f32.mrf.mxu3  ;;  %v2235_v32 = vld [vmem:[#allocation8 + $0x50] sm:$0xf] }
 0x17f   :  { %v3109_v18 = vadd.f32 %v741_v17, %v728_v16 }
 0x180   :  { %v831_v19 = vrot.slane %v830_v14, 2  ;;  %v858_v20 = vadd.f32 %v857_v15, %v848_v13  ;;  %v2668_v13 = vld [vmem:[#allocation8 + $0x54] sm:$0xf0] }
 0x181   :  { %v823_v21 = vrot.slane %v3109_v18, 4  ;;  %v847_v22 = vmul.f32 %v3109_v18, %v3109_v18  ;;  %v756_v12 = vpop.f32.mrf.mxu0  ;;  %v769_v23 = vpop.f32.mrf.mxu1  ;;  %v2236_v17 = vor.u32 %v2668_v13, %v2235_v32  ;;  %v2680_v32 = vld [vmem:[#allocation8 + $0xb4] sm:$0xf0] }
 0x182   :  { %v832_v24 = vadd.f32 %v831_v19, %v830_v14  ;;  %v859_v25 = vrot.slane %v858_v20, 2  ;;  %v2299_v19 = vld [vmem:[#allocation8 + $0xd0] sm:$0xf] }
 0x183   :  { %v824_v26 = vadd.f32 %v823_v21, %v3109_v18  ;;  %v851_v27 = vrot.slane %v847_v22, 4  ;;  %v2363_v23 = vld [vmem:[#allocation8 + $0x150] sm:$0xf]  ;;  %1391 = vmatpush.bf16.msra.mxu2 %v2236_v17  ;;  %v2284_v17 = vor.u32 %v2680_v32, %v2283_v7 }
 0x184   :  { %v833_v30 = vrot.slane %v832_v24, 1  ;;  %v860_v31 = vadd.f32 %v859_v25, %v858_v20  ;;  %v2684_v20 = vld [vmem:[#allocation8 + $0xd4] sm:$0xf0] }
 0x185   :  { %v825_v39 = vrot.slane %v824_v26, 2  ;;  %v852_v40 = vadd.f32 %v851_v27, %v847_v22  ;;  %v2300_v12 = vor.u32 %v2684_v20, %v2299_v19  ;;  %v2347_v19 = vld [vmem:[#allocation8 + $0x130] sm:$0xf]  ;;  %v2696_v20 = vld [vmem:[#allocation8 + $0x134] sm:$0xf0] }
 0x186   :  { %v834_v46 = vadd.f32 %v833_v30, %v832_v24  ;;  %v861_v47 = vrot.slane %v860_v31, 1  ;;  %v730_v8 = vpop.f32.mrf.mxu2  ;;  %v743_v48 = vpop.f32.mrf.mxu3  ;;  %v2700_v24 = vld [vmem:[#allocation8 + $0x154] sm:$0xf0] }
 0x187   :  { %v826_v52 = vadd.f32 %v825_v39, %v824_v26  ;;  %v853_v53 = vrot.slane %v852_v40, 2  ;;  %v2364_v30 = vor.u32 %v2700_v24, %v2363_v23  ;;  %1404 = vmatpush.bf16.msra.mxu3 %v2300_v12  ;;  %v2228_v8 = vor.u32 %v2666_v43, %v2227_v42  ;;  %v2291_v48 = vld [vmem:[#allocation8 + $0xc0] sm:$0xf]  ;;  %v2411_v23 = vld [vmem:[#allocation8 + $0x1b0] sm:$0xf] }
 0x188   :  { %v862_v57 = vadd.f32 %v861_v47, %v860_v31  ;;  %v3115_v58 = vmul.f32 0.125, %v834_v46  ;;  %v2427_v31 = vld [vmem:[#allocation8 + $0x1d0] sm:$0xf]  ;;  %v2712_v24 = vld [vmem:[#allocation8 + $0x1b4] sm:$0xf0] }
 0x189   :  { %v827_v61 = vrot.slane %v826_v52, 1  ;;  %v854_v62 = vadd.f32 %v853_v53, %v852_v40  ;;  %v806_v63 = vpop.f32.mrf.mxu0  ;;  %v819_v0 = vpop.f32.mrf.mxu1  ;;  %v2428_v40 = vor.u32 %v2716_v33, %v2427_v31  ;;  %1417 = vmatpush.bf16.msrb.mxu0 %v2364_v30  ;;  %1392 = vmatpush.bf16.msra.mxu2 %v2228_v8  ;;  %v2211_v30 = vld [vmem:[#allocation8 + $0x20] sm:$0xf]  ;;  %v2662_v31 = vld [vmem:[#allocation8 + $0x24] sm:$0xf0] }
 0x18a   :  { %v880_v4 = vmul.f32 0.125, %v862_v57  ;;  %v884_v5 = vmul.f32 %v3115_v58, %v3115_v58  ;;  %v3119_v6 = vadd.f32 %v819_v0, %v806_v63  ;;  %v2292_v63 = vor.u32 %v2682_v54, %v2291_v48  ;;  %v2714_v0 = vld [vmem:[#allocation8 + $0x1c4] sm:$0xf0] }
 0x18b   :  { %v828_v10 = vadd.f32 %v827_v61, %v826_v52  ;;  %v855_v35 = vrot.slane %v854_v62, 1  ;;  %1430 = vmatpush.bf16.msrb.mxu1 %v2428_v40  ;;  %v2678_v40 = vld [vmem:[#allocation8 + $0xa4] sm:$0xf0] }
 0x18c   :  { %v888_v14 = vsub.f32 %v880_v4, %v884_v5  ;;  %v841_v15 = vrot.slane %v3119_v6, 4  ;;  %v850_v16 = vmul.f32 %v3119_v6, %v3119_v6  ;;  %v2356_v4 = vor.u32 %v2698_v45, %v2355_v55  ;;  %1405 = vmatpush.bf16.msra.mxu3 %v2292_v63  ;;  %v2694_v8 = vld [vmem:[#allocation8 + $0x124] sm:$0xf0]  ;;  %v2660_v45 = vld [vmem:[#allocation8 + $0x14] sm:$0xf0] }
 0x18d   :  { %v856_v21 = vadd.f32 %v855_v35, %v854_v62  ;;  %v3124_v22 = vmul.f32 0.125, %v828_v10  ;;  %v2420_v5 = vor.u32 %v2714_v0, %v2419_v59  ;;  %1393 = vmatpush.bf16.msra.mxu2 %v2220_v37  ;;  %v2267_v59 = vld [vmem:[#allocation8 + $0x90] sm:$0xf]  ;;  %v2676_v63 = vld [vmem:[#allocation8 + $0x94] sm:$0xf0] }
 0x18e   :  { %v892_v25 = vmax.f32 %v888_v14, 0.0  ;;  %v842_v26 = vadd.f32 %v841_v15, %v3119_v6  ;;  %v869_v27 = vrot.slane %v850_v16, 4  ;;  %v780_v28 = vpop.f32.mrf.mxu2  ;;  %v793_v29 = vpop.f32.mrf.mxu3  ;;  %1418 = vmatpush.bf16.msrb.mxu0 %v2356_v4  ;;  %v2331_v0 = vld [vmem:[#allocation8 + $0x110] sm:$0xf]  ;;  %v2195_v37 = vld [vmem:[#allocation8] sm:$0xf] }
 0x18f   :  { %v879_v36 = vmul.f32 0.125, %v856_v21  ;;  %v883_v38 = vmul.f32 %v3124_v22, %v3124_v22  ;;  %v3129_v39 = vadd.f32 %v793_v29, %v780_v28  ;;  %1431 = vmatpush.bf16.msrb.mxu1 %v2420_v5  ;;  %v2348_v28 = vor.u32 %v2696_v20, %v2347_v19  ;;  %v2395_v4 = vld [vmem:[#allocation8 + $0x190] sm:$0xf]  ;;  %v2674_v20 = vld [vmem:[#allocation8 + $0x84] sm:$0xf0] }
 0x190   :  { %v3131_v44 = vadd.f32 1e-05, %v892_v25  ;;  %v843_v46 = vrot.slane %v842_v26, 2  ;;  %v870_v47 = vadd.f32 %v869_v27, %v850_v16  ;;  %v2412_v29 = vor.u32 %v2712_v24, %v2411_v23  ;;  %1406 = vmatpush.bf16.msra.mxu3 %v2284_v17 }
 0x191   :  { %v887_v50 = vsub.f32 %v879_v36, %v883_v38  ;;  %v835_v49 = vrot.slane %v3129_v39, 4  ;;  %v849_v51 = vmul.f32 %v3129_v39, %v3129_v39  ;;  %v808_v52 = vpop.f32.mrf.mxu0  ;;  %v821_v53 = vpop.f32.mrf.mxu1  ;;  %v2275_v38 = vld [vmem:[#allocation8 + $0xa0] sm:$0xf] }
 0x192   :  { %2768 = vrsqrt.f32 %v3131_v44  ;;  %v844_v56 = vadd.f32 %v843_v46, %v842_v26  ;;  %v871_v57 = vrot.slane %v870_v47, 2  ;;  %1419 = vmatpush.bf16.msrb.mxu0 %v2348_v28  ;;  %v2212_v46 = vor.u32 %v2662_v31, %v2211_v30  ;;  %v2710_v52 = vld [vmem:[#allocation8 + $0x1a4] sm:$0xf0] }
 0x193   :  { %v891_v60 = vmax.f32 %v887_v50, 0.0  ;;  %v836_v61 = vadd.f32 %v835_v49, %v3129_v39  ;;  %v863_v62 = vrot.slane %v849_v51, 4  ;;  %1432 = vmatpush.bf16.msrb.mxu1 %v2412_v29  ;;  %v2276_v54 = vor.u32 %v2678_v40, %v2275_v38  ;;  %v2706_v28 = vld [vmem:[#allocation8 + $0x184] sm:$0xf0] }
 0x194   :  { %v845_v2 = vrot.slane %v844_v56, 1  ;;  %v872_v3 = vadd.f32 %v871_v57, %v870_v47  ;;  %v2339_v47 = vld [vmem:[#allocation8 + $0x120] sm:$0xf]  ;;  %1394 = vmatpush.bf16.msra.mxu2 %v2212_v46  ;;  %v2203_v57 = vld [vmem:[#allocation8 + $0x10] sm:$0xf]  ;;  %vm915_vm8 = vweird.f32 %v3131_v44 }
 0x195   :  { %v3138_v9 = vadd.f32 1e-05, %v891_v60  ;;  %v837_v10 = vrot.slane %v836_v61, 2  ;;  %v864_v35 = vadd.f32 %v863_v62, %v849_v51  ;;  %v2403_v51 = vld [vmem:[#allocation8 + $0x1a0] sm:$0xf]  ;;  %v2340_v55 = vor.u32 %v2694_v8, %v2339_v47  ;;  %1407 = vmatpush.bf16.msra.mxu3 %v2276_v54 }
 0x196   :  { %v846_v13 = vadd.f32 %v845_v2, %v844_v56  ;;  %v873_v14 = vrot.slane %v872_v3, 1  ;;  %v782_v15 = vpop.f32.mrf.mxu2  ;;  %v795_v16 = vpop.f32.mrf.mxu3  ;;  %v2404_v56 = vor.u32 %v2710_v52, %v2403_v51  ;;  %v2204_v62 = vor.u32 %v2660_v45, %v2203_v57  ;;  %v2703_v8 = vld [vmem:[#allocation8 + $0x174] sm:$0xf]  ;;  %v2445_v52 = vld [vmem:[#allocation8 + $0x1f8] sm:$0xf0] }
 0x197   :  { %v838_v21 = vadd.f32 %v837_v10, %v836_v61  ;;  %v865_v12 = vrot.slane %v864_v35, 2  ;;  %2770 = vrsqrt.f32 %v3138_v9  ;;  %1420 = vmatpush.bf16.msrb.mxu0 %v2340_v55  ;;  %v2268_v2 = vor.u32 %v2676_v63, %v2267_v59  ;;  %v2658_v15 = vld [vmem:[#allocation8 + $0x4] sm:$0xf0]  ;;  %v2259_v16 = vld [vmem:[#allocation8 + $0x80] sm:$0xf] }
 0x198   :  { %v3140_v25 = vpop.eup %2768  ;;  %v874_v26 = vadd.f32 %v873_v14, %v872_v3  ;;  %v3142_v27 = vmul.f32 0.125, %v846_v13  ;;  %v2692_v3 = vld [vmem:[#allocation8 + $0x114] sm:$0xf0]  ;;  %1433 = vmatpush.bf16.msrb.mxu1 %v2404_v56  ;;  %1395 = vmatpush.bf16.msra.mxu2 %v2204_v62  ;;  %v2196_v19 = vor.u32 %v2658_v15, %v2195_v37  ;;  %v2260_v24 = vor.u32 %v2674_v20, %v2259_v16  ;;  %v2719_v51 = vld [vmem:[#allocation8 + $0x1f4] sm:$0xf] }
 0x199   :  { %v839_v33 = vrot.slane %v838_v21, 1  ;;  %v866_v36 = vadd.f32 %v865_v12, %v864_v35  ;;  %v910_v48 = vmul.f32 %v3140_v25, %v3131_v44  ;;  %v2332_v10 = vor.u32 %v2692_v3, %v2331_v0  ;;  %v2708_v35 = vld [vmem:[#allocation8 + $0x194] sm:$0xf0]  ;;  %v2690_v12 = vld [vmem:[#allocation8 + $0x104] sm:$0xf0]  ;;  %1408 = vmatpush.bf16.msra.mxu3 %v2268_v2 }
 0x19a   :  { %v882_v42 = vmul.f32 0.125, %v874_v26  ;;  %v886_v43 = vmul.f32 %v3142_v27, %v3142_v27  ;;  %v2396_v14 = vor.u32 %v2708_v35, %v2395_v4  ;;  %v2387_v26 = vld [vmem:[#allocation8 + $0x180] sm:$0xf]  ;;  %v2448_v54 = vor.u32 %v2719_v51, %v2445_v52  ;;  %v2245_v55 = vld [vmem:[#allocation8 + $0x68] sm:$0xf0] }
 0x19b   :  { %v840_v50 = vadd.f32 %v839_v33, %v838_v21  ;;  %v867_v49 = vrot.slane %v866_v36, 1  ;;  %v911_v32 = vmul.f32 %v3140_v25, %v910_v48  ;;  %v2323_v21 = vld [vmem:[#allocation8 + $0x100] sm:$0xf]  ;;  %1421 = vmatpush.bf16.msrb.mxu0 %v2332_v10  ;;  %v2388_v31 = vor.u32 %v2706_v28, %v2387_v26  ;;  %v2671_v33 = vld [vmem:[#allocation8 + $0x74] sm:$0xf] }
 0x19c   :  { %v890_v53 = vsub.f32 %v882_v42, %v886_v43  ;;  %1434 = vmatpush.bf16.msrb.mxu1 %v2396_v14  ;;  %v2324_v30 = vor.u32 %v2690_v12, %v2323_v21  ;;  %1396 = vmatpush.bf16.msra.mxu2 %v2196_v19  ;;  %v2687_v42 = vld [vmem:[#allocation8 + $0xf4] sm:$0xf]  ;;  %v2317_v43 = vld [vmem:[#allocation8 + $0xf8] sm:$0xf0]  ;;  %v2685_v56 = vld [vmem:[#allocation8 + $0xe4] sm:$0xf]  ;;  %vm916_vm7 = vweird.f32 %v3140_v25  ;;  %vm905_vm11 = vweird.f32 %v3138_v9 }
 0x19d   :  { %v868_v60 = vadd.f32 %v867_v49, %v866_v36  ;;  %v3149_v61 = vmul.f32 0.125, %v840_v50  ;;  %v3151_v5 = vpop.eup %2770  ;;  %v2253_v36 = vld [vmem:[#allocation8 + $0x78] sm:$0xf0]  ;;  %v3161_v38 = vmul.f32 0.5, %v911_v32  ;;  %v2320_v47 = vor.u32 %v2687_v42, %v2317_v43  ;;  %1409 = vmatpush.bf16.msra.mxu3 %v2260_v24  ;;  %v2309_v57 = vld [vmem:[#allocation8 + $0xe8] sm:$0xf0]  ;;  %vm3184_vm10 = vmor %vm915_vm8, %vm916_vm7 }
 0x19e   :  { %v894_v1 = vmax.f32 %v890_v53, 0.0  ;;  %v900_v23 = vmul.f32 %v3151_v5, %v3138_v9  ;;  %v2256_v40 = vor.u32 %v2671_v33, %v2253_v36  ;;  %v2381_v48 = vld [vmem:[#allocation8 + $0x178] sm:$0xf0]  ;;  %v2669_v53 = vld [vmem:[#allocation8 + $0x64] sm:$0xf]  ;;  %vm906_vm9 = vweird.f32 %v3151_v5 }
 0x19f   :  { %v881_v41 = vmul.f32 0.125, %v868_v60  ;;  %v885_v7 = vmul.f32 %v3149_v61, %v3149_v61  ;;  %1422 = vmatpush.bf16.msrb.mxu0 %v2324_v30  ;;  %v2384_v49 = vor.u32 %v2703_v8, %v2381_v48  ;;  %v2248_v59 = vor.u32 %v2669_v53, %v2245_v55  ;;  %v2701_v62 = vld [vmem:[#allocation8 + $0x164] sm:$0xf]  ;;  %v2373_v63 = vld [vmem:[#allocation8 + $0x168] sm:$0xf0]  ;;  %vm3193_vm13 = vmor %vm905_vm11, %vm906_vm9 }
 0x1a0   :  { %v3156_v13 = vadd.f32 1e-05, %v894_v1  ;;  %v901_v50 = vmul.f32 %v3151_v5, %v900_v23  ;;  %1435 = vmatpush.bf16.msrb.mxu1 %v2388_v31  ;;  %1441 = vmatpush.bf16.msrb.mxu2 %v2256_v40  ;;  %v2312_v60 = vor.u32 %v2685_v56, %v2309_v57  ;;  %v2717_v0 = vld [vmem:[#allocation8 + $0x1e4] sm:$0xf]  ;;  %v2376_v2 = vor.u32 %v2701_v62, %v2373_v63  ;;  %v2437_v3 = vld [vmem:[#allocation8 + $0x1e8] sm:$0xf0] }
 0x1a1   :  { %v889_v17 = vsub.f32 %v881_v41, %v885_v7  ;;  %1454 = vmatpush.bf16.msrb.mxu3 %v2320_v47  ;;  %v2667_v4 = vld [vmem:[#allocation8 + $0x54] sm:$0xf]  ;;  %v2237_v41 = vld [vmem:[#allocation8 + $0x58] sm:$0xf0]  ;;  %v913_v7 = vsub.f32 1.5, %v3161_v38  ;;  %v2440_v35 = vor.u32 %v2717_v0, %v2437_v3 }
 0x1a2   :  { %2772 = vrsqrt.f32 %v3156_v13  ;;  %v902_v10 = vmul.f32 0.5, %v901_v50  ;;  %v2683_v37 = vld [vmem:[#allocation8 + $0xd4] sm:$0xf]  ;;  %v2301_v32 = vld [vmem:[#allocation8 + $0xd8] sm:$0xf0]  ;;  %v2240_v15 = vor.u32 %v2667_v4, %v2237_v41  ;;  %v939_v50 = vrot.slane %v3086_v34, 4 }
 0x1a3   :  { %v893_v29 = vmax.f32 %v889_v17, 0.0  ;;  %1467 = vmatpush.bf16.msra.mxu0 %v2384_v49  ;;  %v2699_v16 = vld [vmem:[#allocation8 + $0x154] sm:$0xf]  ;;  %v2365_v17 = vld [vmem:[#allocation8 + $0x158] sm:$0xf0]  ;;  %v2304_v20 = vor.u32 %v2683_v37, %v2301_v32  ;;  %v914_v42 = vmul.f32 %v3140_v25, %v913_v7  ;;  %vm935_vm15 = vweird.f32 %v3156_v13 }
 0x1a4   :  { %1480 = vmatpush.bf16.msra.mxu1 %v2448_v54  ;;  %1442 = vmatpush.bf16.msrb.mxu2 %v2248_v59  ;;  %v2715_v19 = vld [vmem:[#allocation8 + $0x1d4] sm:$0xf]  ;;  %v2368_v21 = vor.u32 %v2699_v16, %v2365_v17  ;;  %v2429_v12 = vld [vmem:[#allocation8 + $0x1d8] sm:$0xf0]  ;;  %v2665_v23 = vld [vmem:[#allocation8 + $0x44] sm:$0xf] }
 0x1a5   :  { %v3163_v46 = vadd.f32 1e-05, %v893_v29  ;;  %1455 = vmatpush.bf16.msrb.mxu3 %v2312_v60  ;;  %v2229_v24 = vld [vmem:[#allocation8 + $0x48] sm:$0xf0]  ;;  %v2432_v29 = vor.u32 %v2715_v19, %v2429_v12  ;;  %v2681_v30 = vld [vmem:[#allocation8 + $0xc4] sm:$0xf]  ;;  %v918_v9 = vsel %vm3184_vm10, %v3140_v25, %v914_v42 }
 0x1a6   :  { %v2293_v31 = vld [vmem:[#allocation8 + $0xc8] sm:$0xf0]  ;;  %v2697_v36 = vld [vmem:[#allocation8 + $0x144] sm:$0xf]  ;;  %v903_v43 = vsub.f32 1.5, %v902_v10  ;;  %v2232_v8 = vor.u32 %v2665_v23, %v2229_v24  ;;  %v945_v12 = vrot.slane %v918_v9, 7 }
 0x1a7   :  { %2774 = vrsqrt.f32 %v3163_v46  ;;  %1468 = vmatpush.bf16.msra.mxu0 %v2376_v2  ;;  %v2357_v38 = vld [vmem:[#allocation8 + $0x148] sm:$0xf0]  ;;  %v2713_v40 = vld [vmem:[#allocation8 + $0x1c4] sm:$0xf]  ;;  %v2296_v51 = vor.u32 %v2681_v30, %v2293_v31  ;;  %v2663_v54 = vld [vmem:[#allocation8 + $0x34] sm:$0xf]  ;;  %vm925_vm2 = vweird.f32 %v3163_v46 }
 0x1a8   :  { %v3167_v45 = vpop.eup %2772  ;;  %1481 = vmatpush.bf16.msra.mxu1 %v2440_v35  ;;  %1443 = vmatpush.bf16.msrb.mxu2 %v2240_v15  ;;  %v2421_v48 = vld [vmem:[#allocation8 + $0x1c8] sm:$0xf0]  ;;  %v2360_v52 = vor.u32 %v2697_v36, %v2357_v38  ;;  %v2221_v55 = vld [vmem:[#allocation8 + $0x38] sm:$0xf0]  ;;  %v2679_v56 = vld [vmem:[#allocation8 + $0xb4] sm:$0xf]  ;;  %v904_v0 = vmul.f32 %v3151_v5, %v903_v43 }
 0x1a9   :  { %v930_v1 = vmul.f32 %v3167_v45, %v3156_v13  ;;  %1456 = vmatpush.bf16.msrb.mxu3 %v2304_v20  ;;  %vm936_vm12 = vweird.f32 %v3167_v45  ;;  %v2424_v53 = vor.u32 %v2713_v40, %v2421_v48  ;;  %v2285_v62 = vld [vmem:[#allocation8 + $0xb8] sm:$0xf0]  ;;  %v2695_v63 = vld [vmem:[#allocation8 + $0x134] sm:$0xf]  ;;  %v2661_v35 = vld [vmem:[#allocation8 + $0x24] sm:$0xf] }
 0x1aa   :  { %v2349_v2 = vld [vmem:[#allocation8 + $0x138] sm:$0xf0]  ;;  %v2711_v3 = vld [vmem:[#allocation8 + $0x1b4] sm:$0xf]  ;;  %vm3205_vm0 = vmor %vm935_vm15, %vm936_vm12  ;;  %v2288_v25 = vor.u32 %v2679_v56, %v2285_v62  ;;  %v908_v23 = vsel %vm3193_vm13, %v3151_v5, %v904_v0 }
 0x1ab   :  { %v931_v14 = vmul.f32 %v3167_v45, %v930_v1  ;;  %1469 = vmatpush.bf16.msra.mxu0 %v2368_v21  ;;  %v2224_v1 = vor.u32 %v2663_v54, %v2221_v55  ;;  %v2413_v4 = vld [vmem:[#allocation8 + $0x1b8] sm:$0xf0]  ;;  %v2352_v10 = vor.u32 %v2695_v63, %v2349_v2  ;;  %v2213_v13 = vld [vmem:[#allocation8 + $0x28] sm:$0xf0]  ;;  %v2677_v32 = vld [vmem:[#allocation8 + $0xa4] sm:$0xf] }
 0x1ac   :  { %1482 = vmatpush.bf16.msra.mxu1 %v2432_v29  ;;  %1444 = vmatpush.bf16.msrb.mxu2 %v2232_v8  ;;  %v2416_v37 = vor.u32 %v2711_v3, %v2413_v4  ;;  %v2693_v15 = vld [vmem:[#allocation8 + $0x124] sm:$0xf]  ;;  %v2341_v19 = vld [vmem:[#allocation8 + $0x128] sm:$0xf0]  ;;  %v2216_v24 = vor.u32 %v2661_v35, %v2213_v13  ;;  %v2205_v30 = vld [vmem:[#allocation8 + $0x18] sm:$0xf0]  ;;  %v948_v8 = vsel %vm302_vm5, %v908_v23, %v945_v12 }
 0x1ad   :  { %v3173_v26 = vpop.eup %2774  ;;  %v932_v28 = vmul.f32 0.5, %v931_v14  ;;  %1457 = vmatpush.bf16.msrb.mxu3 %v2296_v51  ;;  %v2277_v14 = vld [vmem:[#allocation8 + $0xa8] sm:$0xf0]  ;;  %v2709_v20 = vld [vmem:[#allocation8 + $0x1a4] sm:$0xf]  ;;  %v2344_v29 = vor.u32 %v2693_v15, %v2341_v19 }
 0x1ae   :  { %v920_v33 = vmul.f32 %v3173_v26, %v3163_v46  ;;  %vm926_vm1 = vweird.f32 %v3173_v26  ;;  %v2405_v21 = vld [vmem:[#allocation8 + $0x1a8] sm:$0xf0]  ;;  %v2280_v46 = vor.u32 %v2677_v32, %v2277_v14  ;;  %v2675_v31 = vld [vmem:[#allocation8 + $0x94] sm:$0xf]  ;;  %v2333_v42 = vld [vmem:[#allocation8 + $0x118] sm:$0xf0] }
 0x1af   :  { %v933_v47 = vsub.f32 1.5, %v932_v28  ;;  %1470 = vmatpush.bf16.msra.mxu0 %v2360_v52  ;;  %vm927_vm3 = vmor %vm925_vm2, %vm926_vm1  ;;  %v2659_v28 = vld [vmem:[#allocation8 + $0x14] sm:$0xf]  ;;  %v2408_v5 = vor.u32 %v2709_v20, %v2405_v21  ;;  %v2657_v52 = vld [vmem:[#allocation8 + $0x4] sm:$0xf] }
 0x1b0   :  { %v921_v49 = vmul.f32 %v3173_v26, %v920_v33  ;;  %1483 = vmatpush.bf16.msra.mxu1 %v2424_v53  ;;  %1445 = vmatpush.bf16.msrb.mxu2 %v2224_v1  ;;  %v2269_v33 = vld [vmem:[#allocation8 + $0x98] sm:$0xf0]  ;;  %v2691_v40 = vld [vmem:[#allocation8 + $0x114] sm:$0xf]  ;;  %v2197_v53 = vld [vmem:[#allocation8 + $0x8] sm:$0xf0] }
 0x1b1   :  { %v934_v59 = vmul.f32 %v3167_v45, %v933_v47  ;;  %1458 = vmatpush.bf16.msrb.mxu3 %v2288_v25  ;;  %v2707_v43 = vld [vmem:[#allocation8 + $0x194] sm:$0xf]  ;;  %v2397_v47 = vld [vmem:[#allocation8 + $0x198] sm:$0xf0]  ;;  %v2336_v51 = vor.u32 %v2691_v40, %v2333_v42  ;;  %v2673_v54 = vld [vmem:[#allocation8 + $0x84] sm:$0xf]  ;;  %v2200_v2 = vor.u32 %v2657_v52, %v2197_v53 }
 0x1b2   :  { %v922_v60 = vmul.f32 0.5, %v921_v49  ;;  %v2272_v49 = vor.u32 %v2675_v31, %v2269_v33  ;;  %v2400_v56 = vor.u32 %v2707_v43, %v2397_v47  ;;  %v2261_v57 = vld [vmem:[#allocation8 + $0x88] sm:$0xf0]  ;;  %v2705_v62 = vld [vmem:[#allocation8 + $0x184] sm:$0xf] }
 0x1b3   :  { %v938_v16 = vsel %vm3205_vm0, %v3167_v45, %v934_v59  ;;  %1471 = vmatpush.bf16.msra.mxu0 %v2352_v10  ;;  %v2689_v59 = vld [vmem:[#allocation8 + $0x104] sm:$0xf]  ;;  %v2389_v63 = vld [vmem:[#allocation8 + $0x188] sm:$0xf0]  ;;  %v2264_v4 = vor.u32 %v2673_v54, %v2261_v57 }
 0x1b4   :  { %v923_v7 = vsub.f32 1.5, %v922_v60  ;;  %v947_v36 = vrot.slane %v938_v16, 5  ;;  %1484 = vmatpush.bf16.msra.mxu1 %v2416_v37  ;;  %1446 = vmatpush.bf16.msrb.mxu2 %v2216_v24  ;;  %v2325_v60 = vld [vmem:[#allocation8 + $0x108] sm:$0xf0] }
 0x1b5   :  { %1459 = vmatpush.bf16.msrb.mxu3 %v2280_v46  ;;  %v2328_v41 = vor.u32 %v2689_v59, %v2325_v60  ;;  %v3231_v14 = vld [vmem:[#allocation11 + $0x8] sm:$0xff] }
 0x1b6   :  { %v924_v17 = vmul.f32 %v3173_v26, %v923_v7  ;;  %v2392_v7 = vor.u32 %v2705_v62, %v2389_v63 }
 0x1b7   :  { %1472 = vmatpush.bf16.msra.mxu0 %v2344_v29 }
 0x1b8   :  { %v928_v45 = vsel %vm927_vm3, %v3173_v26, %v924_v17  ;;  %v2208_v26 = vor.u32 %v2659_v28, %v2205_v30  ;;  %1485 = vmatpush.bf16.msra.mxu1 %v2408_v5 }
 0x1b9   :  { %v946_v38 = vrot.slane %v928_v45, 6  ;;  %1460 = vmatpush.bf16.msrb.mxu3 %v2272_v49 }
 0x1ba   :  { %1447 = vmatpush.bf16.msrb.mxu2 %v2208_v26 }
 0x1bb   :  { %v950_v48 = vsel %vm949_vm14, %v946_v38, %v947_v36  ;;  %1473 = vmatpush.bf16.msra.mxu0 %v2336_v51 }
 0x1bc   :  { %v952_v44 = vsel %vm951_vm4, %v948_v8, %v950_v48  ;;  %1486 = vmatpush.bf16.msra.mxu1 %v2400_v56 }
 0x1bd   :  { %v954_v55 = vmul.f32 %v952_v44, %v939_v50  ;;  %1461 = vmatpush.bf16.msrb.mxu3 %v2264_v4  ;;  %v2507_v4 = vld [vmem:[#allocation10 + $0x70] sm:$0xf] }
 0x1be   :  { %1448 = vmatpush.bf16.msrb.mxu2 %v2200_v2 }
 0x1bf   :  { %v958_v9 = vperm.slane %v954_v55, 2  ;;  %v959_v0 = vperm.slane %v954_v55, 3  ;;  %v957_v1 = vperm.slane %v954_v55, 1  ;;  %v956_v3 = vperm.slane %v954_v55, 0  ;;  %1474 = vmatpush.bf16.msra.mxu0 %v2328_v41  ;;  %v2736_v41 = vld [vmem:[#allocation10 + $0x74] sm:$0xf0] }
 0x1c0   :  { %1487 = vmatpush.bf16.msra.mxu1 %v2392_v7 }
 0x1c1   :  { %v966_v34 = vmul.f32 %v958_v9, %v3149_v61  ;;  %v967_v50 = vmul.f32 %v959_v0, %v3142_v27  ;;  %v965_v25 = vmul.f32 %v957_v1, %v3115_v58  ;;  %v964_v13 = vmul.f32 %v956_v3, %v3124_v22 }
 0x1c2   :  { %v982_v58 = vmul.f32 %v958_v9, %v3129_v39  ;;  %v980_v16 = vmul.f32 %v956_v3, %v3109_v18  ;;  %v981_v22 = vmul.f32 %v957_v1, %v3103_v11  ;;  %v983_v17 = vmul.f32 %v959_v0, %v3119_v6 }
 0x1c3   :  { %v973_v10 = vrot.slane %v966_v34, 6  ;;  %v974_v35 = vrot.slane %v967_v50, 5  ;;  %v972_v37 = vrot.slane %v965_v25, 7  ;;  %v2571_v34 = vld [vmem:[#allocation10 + $0xf0] sm:$0xf] }
 0x1c5   :  { %v976_v32 = vsel %vm949_vm14, %v973_v10, %v974_v35  ;;  %v975_v61 = vsel %vm302_vm5, %v964_v13, %v972_v37  ;;  %v2508_v10 = vor.u32 %v2736_v41, %v2507_v4  ;;  %v2752_v35 = vld [vmem:[#allocation10 + $0xf4] sm:$0xf0]  ;;  %v2735_v13 = vld [vmem:[#allocation10 + $0x74] sm:$0xf]  ;;  %v2745_v4 = vld [vmem:[#allocation10 + $0xc4] sm:$0xf] }
 0x1c6   :  { %v977_v27 = vsel %vm951_vm4, %v975_v61, %v976_v32  ;;  %v2572_v37 = vor.u32 %v2752_v35, %v2571_v34  ;;  %v2509_v32 = vld [vmem:[#allocation10 + $0x78] sm:$0xf0]  ;;  %v2751_v61 = vld [vmem:[#allocation10 + $0xf4] sm:$0xf]  ;;  %v2549_v41 = vld [vmem:[#allocation10 + $0xc8] sm:$0xf0] }
 0x1c7   :  { %v979_v15 = vsub.f32 %v3231_v14, %v977_v27  ;;  %v2573_v27 = vld [vmem:[#allocation10 + $0xf8] sm:$0xf0]  ;;  %v2475_v34 = vld [vmem:[#allocation10 + $0x30] sm:$0xf] }
 0x1c9   :  { %v985_v19 = vperm.slane %v979_v15, 0  ;;  %v986_v20 = vperm.slane %v979_v15, 1  ;;  %v987_v21 = vperm.slane %v979_v15, 2  ;;  %v988_v12 = vperm.slane %v979_v15, 3 }
 0x1cb   :  { %v993_v23 = vadd.f32 %v985_v19, %v980_v16  ;;  %v994_v24 = vadd.f32 %v986_v20, %v981_v22  ;;  %v995_v28 = vadd.f32 %v987_v21, %v982_v58  ;;  %v996_v45 = vadd.f32 %v988_v12, %v983_v17  ;;  %v2499_v17 = vld [vmem:[#allocation10 + $0x60] sm:$0xf]  ;;  %v2734_v19 = vld [vmem:[#allocation10 + $0x64] sm:$0xf0] }
 0x1cc   :  { %v2512_v16 = vor.u32 %v2735_v13, %v2509_v32  ;;  %v2576_v22 = vor.u32 %v2751_v61, %v2573_v27  ;;  %v2500_v12 = vor.u32 %v2734_v19, %v2499_v17  ;;  %v2552_v13 = vor.u32 %v2745_v4, %v2549_v41  ;;  %v2539_v32 = vld [vmem:[#allocation10 + $0xb0] sm:$0xf]  ;;  %v2744_v61 = vld [vmem:[#allocation10 + $0xb4] sm:$0xf0]  ;;  %v2727_v27 = vld [vmem:[#allocation10 + $0x34] sm:$0xf] }
 0x1cd   :  { %v997_v46 = vmax.f32 %v993_v23, 0.0  ;;  %v998_v29 = vmax.f32 %v994_v24, 0.0  ;;  %v999_v30 = vmax.f32 %v995_v28, 0.0  ;;  %v1000_v31 = vmax.f32 %v996_v45, 0.0  ;;  %v2563_v23 = vld [vmem:[#allocation10 + $0xe0] sm:$0xf] }
 0x1ce   :  { %v2750_v24 = vld [vmem:[#allocation10 + $0xe4] sm:$0xf0]  ;;  %v2733_v28 = vld [vmem:[#allocation10 + $0x64] sm:$0xf]  ;;  %v2743_v17 = vld [vmem:[#allocation10 + $0xb4] sm:$0xf] }
 0x1cf   :  { %v1001_v33 = vpack.c.bf16 %v997_v46, %v997_v46  ;;  %v1002_v39 = vpack.c.bf16 %v998_v29, %v998_v29  ;;  %v1003_v36 = vpack.c.bf16 %v999_v30, %v999_v30  ;;  %v1004_v18 = vpack.c.bf16 %v1000_v31, %v1000_v31  ;;  %v2501_v30 = vld [vmem:[#allocation10 + $0x68] sm:$0xf0]  ;;  %v2749_v31 = vld [vmem:[#allocation10 + $0xe4] sm:$0xf]  ;;  %v2541_v19 = vld [vmem:[#allocation10 + $0xb8] sm:$0xf0] }
 0x1d0   :  { %v2564_v29 = vor.u32 %v2750_v24, %v2563_v23  ;;  %v2531_v23 = vld [vmem:[#allocation10 + $0xa0] sm:$0xf]  ;;  %v2517_v4 = vld [vmem:[#allocation10 + $0x88] sm:$0xf0] }
 0x1d1   :  { %1397 = vmatmul.bf16.vlgmr.msra.gmra.mxu2 %v1001_v33  ;;  %1410 = vmatmul.bf16.vlgmr.msra.gmra.mxu3 %v1002_v39 }
 0x1d2   :  { %1423 = vmatmul.bf16.vlgmr.msrb.gmra.mxu0 %v1003_v36  ;;  %1436 = vmatmul.bf16.vlgmr.msrb.gmra.mxu1 %v1004_v18 }
 0x1d3   :  { %1785 = vmatpush.bf16.msra.mxu2 %v2508_v10  ;;  %1798 = vmatpush.bf16.msra.mxu3 %v2572_v37  ;;  %v2728_v37 = vld [vmem:[#allocation10 + $0x34] sm:$0xf0] }
 0x1d4   :  { %1811 = vmatpush.bf16.msrb.mxu0 %v2512_v16  ;;  %1824 = vmatpush.bf16.msrb.mxu1 %v2576_v22  ;;  %v2476_v22 = vor.u32 %v2728_v37, %v2475_v34 }
 0x1d7   :  { %1786 = vmatpush.bf16.msra.mxu2 %v2500_v12  ;;  %1799 = vmatpush.bf16.msra.mxu3 %v2564_v29  ;;  %v2726_v12 = vld [vmem:[#allocation10 + $0x24] sm:$0xf0]  ;;  %v2544_v29 = vor.u32 %v2743_v17, %v2541_v19 }
 0x1e1   :  { %1449 = vmatmul.bf16.vlgmr.msrb.gmra.mxu2 %v1001_v33  ;;  %1462 = vmatmul.bf16.vlgmr.msrb.gmra.mxu3 %v1002_v39 }
 0x1e2   :  { %1475 = vmatmul.bf16.vlgmr.msra.gmra.mxu0 %v1003_v36  ;;  %1488 = vmatmul.bf16.vlgmr.msra.gmra.mxu1 %v1004_v18  ;;  %v2504_v36 = vor.u32 %v2733_v28, %v2501_v30  ;;  %v2565_v18 = vld [vmem:[#allocation10 + $0xe8] sm:$0xf0]  ;;  %v2742_v30 = vld [vmem:[#allocation10 + $0xa4] sm:$0xf0] }
 0x1e4   :  { %1812 = vmatpush.bf16.msrb.mxu0 %v2504_v36  ;;  %v2741_v36 = vld [vmem:[#allocation10 + $0xa4] sm:$0xf] }
 0x24f   :  { %v1424_v11 = vpop.f32.mrf.mxu0  ;;  %v1437_v6 = vpop.f32.mrf.mxu1 }
 0x254   :  { %v1398_v38 = vpop.f32.mrf.mxu2  ;;  %v1411_v5 = vpop.f32.mrf.mxu3 }
 0x255   :  { %v1412_v40 = vadd.f32 %v1411_v5, %v1398_v38 }
 0x257   :  { %v1425_v42 = vadd.f32 %v1424_v11, %v1412_v40  ;;  %v1426_v43 = vpop.f32.mrf.mxu0  ;;  %v1439_v47 = vpop.f32.mrf.mxu1  ;;  %v2491_v11 = vld [vmem:[#allocation10 + $0x50] sm:$0xf]  ;;  %v2568_v40 = vor.u32 %v2749_v31, %v2565_v18  ;;  %v2725_v31 = vld [vmem:[#allocation10 + $0x24] sm:$0xf]  ;;  %v2533_v18 = vld [vmem:[#allocation10 + $0xa8] sm:$0xf0] }
 0x258   :  { %v2555_v43 = vld [vmem:[#allocation10 + $0xd0] sm:$0xf]  ;;  %v2748_v47 = vld [vmem:[#allocation10 + $0xd4] sm:$0xf0] }
 0x259   :  { %v3240_v8 = vadd.f32 %v1437_v6, %v1425_v42  ;;  %v2732_v6 = vld [vmem:[#allocation10 + $0x54] sm:$0xf0]  ;;  %1825 = vmatpush.bf16.msrb.mxu1 %v2568_v40 }
 0x25a   :  { %v2492_v42 = vor.u32 %v2732_v6, %v2491_v11  ;;  %v2724_v40 = vld [vmem:[#allocation10 + $0x14] sm:$0xf0] }
 0x25b   :  { %v1493_v48 = vrot.slane %v3240_v8, 4  ;;  %v1505_v26 = vmul.f32 %v3240_v8, %v3240_v8 }
 0x25c   :  { %v1400_v44 = vpop.f32.mrf.mxu2  ;;  %v1413_v49 = vpop.f32.mrf.mxu3  ;;  %1787 = vmatpush.bf16.msra.mxu2 %v2492_v42  ;;  %v2523_v42 = vld [vmem:[#allocation10 + $0x90] sm:$0xf] }
 0x25d   :  { %v1494_v51 = vadd.f32 %v1493_v48, %v3240_v8  ;;  %v1507_v52 = vrot.slane %v1505_v26, 4  ;;  %v2556_v48 = vor.u32 %v2748_v47, %v2555_v43  ;;  %v2493_v44 = vld [vmem:[#allocation10 + $0x58] sm:$0xf0]  ;;  %v2747_v49 = vld [vmem:[#allocation10 + $0xd4] sm:$0xf] }
 0x25f   :  { %v1495_v53 = vrot.slane %v1494_v51, 2  ;;  %v1508_v54 = vadd.f32 %v1507_v52, %v1505_v26  ;;  %v1476_v55 = vpop.f32.mrf.mxu0  ;;  %v1489_v56 = vpop.f32.mrf.mxu1  ;;  %v2731_v26 = vld [vmem:[#allocation10 + $0x54] sm:$0xf]  ;;  %1800 = vmatpush.bf16.msra.mxu3 %v2556_v48  ;;  %v2536_v48 = vor.u32 %v2741_v36, %v2533_v18 }
 0x261   :  { %v1496_v57 = vadd.f32 %v1495_v53, %v1494_v51  ;;  %v1509_v59 = vrot.slane %v1508_v54, 2  ;;  %v2496_v53 = vor.u32 %v2731_v26, %v2493_v44  ;;  %v2740_v26 = vld [vmem:[#allocation10 + $0x94] sm:$0xf0]  ;;  %v2723_v44 = vld [vmem:[#allocation10 + $0x14] sm:$0xf] }
 0x263   :  { %v1497_v63 = vrot.slane %v1496_v57, 1  ;;  %v1510_v9 = vadd.f32 %v1509_v59, %v1508_v54  ;;  %v2557_v54 = vld [vmem:[#allocation10 + $0xd8] sm:$0xf0]  ;;  %v2547_v59 = vld [vmem:[#allocation10 + $0xc0] sm:$0xf]  ;;  %1813 = vmatpush.bf16.msrb.mxu0 %v2496_v53 }
 0x264   :  { %v1450_v60 = vpop.f32.mrf.mxu2  ;;  %v1463_v62 = vpop.f32.mrf.mxu3  ;;  %v2525_v53 = vld [vmem:[#allocation10 + $0x98] sm:$0xf0] }
 0x265   :  { %v1464_v0 = vadd.f32 %v1463_v62, %v1450_v60  ;;  %v1498_v50 = vadd.f32 %v1497_v63, %v1496_v57  ;;  %v1511_v7 = vrot.slane %v1510_v9, 1  ;;  %v2730_v57 = vld [vmem:[#allocation10 + $0x44] sm:$0xf0] }
 0x266   :  { %v2746_v60 = vld [vmem:[#allocation10 + $0xc4] sm:$0xf0] }
 0x267   :  { %v1477_v1 = vadd.f32 %v1476_v55, %v1464_v0  ;;  %v1478_v2 = vpop.f32.mrf.mxu0  ;;  %v1491_v3 = vpop.f32.mrf.mxu1  ;;  %v3252_v33 = vmul.f32 0.125, %v1498_v50  ;;  %v1512_v39 = vadd.f32 %v1511_v7, %v1510_v9  ;;  %v2483_v55 = vld [vmem:[#allocation10 + $0x40] sm:$0xf] }
 0x268   :  { %v2484_v0 = vor.u32 %v2730_v57, %v2483_v55  ;;  %v2485_v2 = vld [vmem:[#allocation10 + $0x48] sm:$0xf0]  ;;  %v2548_v3 = vor.u32 %v2746_v60, %v2547_v59  ;;  %v2451_v57 = vld [vmem:[#allocation10] sm:$0xf]  ;;  %v2722_v59 = vld [vmem:[#allocation10 + $0x4] sm:$0xf0] }
 0x269   :  { %v3246_v25 = vadd.f32 %v1489_v56, %v1477_v1  ;;  %v2560_v56 = vor.u32 %v2747_v49, %v2557_v54  ;;  %v1521_v62 = vmul.f32 0.125, %v1512_v39  ;;  %v2729_v1 = vld [vmem:[#allocation10 + $0x44] sm:$0xf]  ;;  %v1523_v50 = vmul.f32 %v3252_v33, %v3252_v33  ;;  %v2469_v39 = vld [vmem:[#allocation10 + $0x28] sm:$0xf0] }
 0x26a   :  { %v2488_v35 = vor.u32 %v2729_v1, %v2485_v2  ;;  %1788 = vmatpush.bf16.msra.mxu2 %v2484_v0  ;;  %1801 = vmatpush.bf16.msra.mxu3 %v2548_v3  ;;  %v2472_v47 = vor.u32 %v2725_v31, %v2469_v39  ;;  %v2515_v60 = vld [vmem:[#allocation10 + $0x80] sm:$0xf]  ;;  %v2721_v0 = vld [vmem:[#allocation10 + $0x4] sm:$0xf]  ;;  %v2453_v2 = vld [vmem:[#allocation10 + $0x8] sm:$0xf0]  ;;  %v2452_v41 = vor.u32 %v2722_v59, %v2451_v57 }
 0x26b   :  { %v1499_v15 = vrot.slane %v3246_v25, 4  ;;  %v1506_v58 = vmul.f32 %v3246_v25, %v3246_v25  ;;  %1826 = vmatpush.bf16.msrb.mxu1 %v2560_v56  ;;  %v1525_v24 = vsub.f32 %v1521_v62, %v1523_v50  ;;  %v2524_v56 = vor.u32 %v2740_v26, %v2523_v42  ;;  %v2737_v3 = vld [vmem:[#allocation10 + $0x84] sm:$0xf] }
 0x26c   :  { %v1452_v20 = vpop.f32.mrf.mxu2  ;;  %v1465_v21 = vpop.f32.mrf.mxu3  ;;  %1814 = vmatpush.bf16.msrb.mxu0 %v2488_v35  ;;  %v2456_v50 = vor.u32 %v2721_v0, %v2453_v2 }
 0x26d   :  { %v1500_v45 = vadd.f32 %v1499_v15, %v3246_v25  ;;  %v1513_v46 = vrot.slane %v1506_v58, 4  ;;  %v2477_v15 = vld [vmem:[#allocation10 + $0x38] sm:$0xf0]  ;;  %v2540_v20 = vor.u32 %v2744_v61, %v2539_v32  ;;  %v2467_v21 = vld [vmem:[#allocation10 + $0x20] sm:$0xf]  ;;  %v1527_v49 = vmax.f32 %v1525_v24, 0.0 }
 0x26e   :  { %1789 = vmatpush.bf16.msra.mxu2 %v2476_v22  ;;  %v2468_v6 = vor.u32 %v2726_v12, %v2467_v21  ;;  %v1552_v21 = vrot.slane %v3231_v14, 4 }
 0x26f   :  { %v1501_v38 = vrot.slane %v1500_v45, 2  ;;  %v1514_v5 = vadd.f32 %v1513_v46, %v1506_v58  ;;  %1827 = vmatpush.bf16.msrb.mxu1 %v2552_v13  ;;  %v2480_v46 = vor.u32 %v2727_v27, %v2477_v15  ;;  %1802 = vmatpush.bf16.msra.mxu3 %v2540_v20  ;;  %v1529_v1 = vadd.f32 1e-05, %v1527_v49 }
 0x271   :  { %v1502_v51 = vadd.f32 %v1501_v38, %v1500_v45  ;;  %v1515_v52 = vrot.slane %v1514_v5, 2  ;;  %v2532_v38 = vor.u32 %v2742_v30, %v2531_v23  ;;  %1815 = vmatpush.bf16.msrb.mxu0 %v2480_v46  ;;  %vm1537_vm10 = vweird.f32 %v1529_v1 }
 0x272   :  { %1790 = vmatpush.bf16.msra.mxu2 %v2468_v6  ;;  %v1567_v30 = vrot.slane %v3231_v14, 6  ;;  %v116_v14 = vld [vmem:[#allocation11 + $0x10] sm:$0x3] }
 0x273   :  { %v1503_v63 = vrot.slane %v1502_v51, 1  ;;  %v1516_v9 = vadd.f32 %v1515_v52, %v1514_v5  ;;  %v2459_v5 = vld [vmem:[#allocation10 + $0x10] sm:$0xf]  ;;  %1828 = vmatpush.bf16.msrb.mxu1 %v2544_v29  ;;  %v2739_v52 = vld [vmem:[#allocation10 + $0x94] sm:$0xf]  ;;  %1803 = vmatpush.bf16.msra.mxu3 %v2532_v38 }
 0x274   :  { %v2460_v55 = vor.u32 %v2724_v40, %v2459_v5 }
 0x275   :  { %v1504_v7 = vadd.f32 %v1503_v63, %v1502_v51  ;;  %v1517_v10 = vrot.slane %v1516_v9, 1  ;;  %v2461_v51 = vld [vmem:[#allocation10 + $0x18] sm:$0xf0]  ;;  %1816 = vmatpush.bf16.msrb.mxu0 %v2472_v47  ;;  %v2528_v63 = vor.u32 %v2739_v52, %v2525_v53 }
 0x276   :  { %v2464_v62 = vor.u32 %v2723_v44, %v2461_v51  ;;  %1791 = vmatpush.bf16.msra.mxu2 %v2460_v55 }
 0x277   :  { %v1518_v58 = vadd.f32 %v1517_v10, %v1516_v9  ;;  %v3256_v16 = vmul.f32 0.125, %v1504_v7  ;;  %1829 = vmatpush.bf16.msrb.mxu1 %v2536_v48  ;;  %v2738_v9 = vld [vmem:[#allocation10 + $0x84] sm:$0xf0]  ;;  %1804 = vmatpush.bf16.msra.mxu3 %v2524_v56  ;;  %v2520_v7 = vor.u32 %v2737_v3, %v2517_v4 }
 0x278   :  { %v2516_v34 = vor.u32 %v2738_v9, %v2515_v60 }
 0x279   :  { %v1522_v28 = vmul.f32 0.125, %v1518_v58  ;;  %v1524_v45 = vmul.f32 %v3256_v16, %v3256_v16  ;;  %1817 = vmatpush.bf16.msrb.mxu0 %v2464_v62 }
 0x27a   :  { %1792 = vmatpush.bf16.msra.mxu2 %v2452_v41 }
 0x27b   :  { %v1526_v11 = vsub.f32 %v1522_v28, %v1524_v45  ;;  %1830 = vmatpush.bf16.msrb.mxu1 %v2528_v63  ;;  %1805 = vmatpush.bf16.msra.mxu3 %v2516_v34 }
 0x27d   :  { %v1528_v43 = vmax.f32 %v1526_v11, 0.0  ;;  %1818 = vmatpush.bf16.msrb.mxu0 %v2456_v50 }
 0x27f   :  { %v1530_v54 = vadd.f32 1e-05, %v1528_v43  ;;  %1831 = vmatpush.bf16.msrb.mxu1 %v2520_v7 }
 0x281   :  { %2776 = vrsqrt.f32 %v1530_v54  ;;  %vm1547_vm8 = vweird.f32 %v1530_v54 }
 0x282   :  { %2778 = vrsqrt.f32 %v1529_v1 }
 0x287   :  { %v2777_v10 = vpop.eup %2776 }
 0x288   :  { %v1542_v35 = vmul.f32 %v2777_v10, %v1530_v54  ;;  %v2779_v13 = vpop.eup %2778  ;;  %vm1548_vm6 = vweird.f32 %v2777_v10 }
 0x289   :  { %v1532_v37 = vmul.f32 %v2779_v13, %v1529_v1  ;;  %vm1538_vm7 = vweird.f32 %v2779_v13  ;;  %vm1549_vm9 = vmor %vm1547_vm8, %vm1548_vm6 }
 0x28a   :  { %v1543_v32 = vmul.f32 %v2777_v10, %v1542_v35  ;;  %vm1539_vm11 = vmor %vm1537_vm10, %vm1538_vm7 }
 0x28b   :  { %v1533_v61 = vmul.f32 %v2779_v13, %v1532_v37 }
 0x28c   :  { %v1544_v27 = vmul.f32 0.5, %v1543_v32 }
 0x28d   :  { %v1534_v15 = vmul.f32 0.5, %v1533_v61 }
 0x28e   :  { %v1545_v58 = vsub.f32 1.5, %v1544_v27 }
 0x28f   :  { %v1535_v22 = vsub.f32 1.5, %v1534_v15 }
 0x290   :  { %v1546_v17 = vmul.f32 %v2777_v10, %v1545_v58 }
 0x291   :  { %v1536_v19 = vmul.f32 %v2779_v13, %v1535_v22 }
 0x292   :  { %v1550_v20 = vsel %vm1549_vm9, %v2777_v10, %v1546_v17 }
 0x293   :  { %v1556_v12 = vrot.slane %v1550_v20, 7  ;;  %v1540_v23 = vsel %vm1539_vm11, %v2779_v13, %v1536_v19 }
 0x295   :  { %v1557_v24 = vsel %vm302_vm5, %v1540_v23, %v1556_v12 }
 0x296   :  { %v1559_v28 = vmul.f32 %v1557_v24, %v1552_v21 }
 0x298   :  { %v1561_v45 = vperm.slane %v1559_v28, 0  ;;  %v1562_v46 = vperm.slane %v1559_v28, 1 }
 0x29a   :  { %v1566_v29 = vmul.f32 %v1562_v46, %v3256_v16  ;;  %v1565_v31 = vmul.f32 %v1561_v45, %v3252_v33  ;;  %v1575_v11 = vmul.f32 %v1561_v45, %v3240_v8  ;;  %v1576_v38 = vmul.f32 %v1562_v46, %v3246_v25 }
 0x29b   :  { %v1622_v33 = vperm.slane %v116_v14, 1  ;;  %v1621_v8 = vperm.slane %v116_v14, 0 }
 0x29c   :  { %v1571_v39 = vrot.slane %v1566_v29, 7 }
 0x29e   :  { %v1572_v36 = vsel %vm302_vm5, %v1565_v31, %v1571_v39 }
 0x29f   :  { %v1574_v18 = vsub.f32 %v1567_v30, %v1572_v36 }
 0x2a1   :  { %v1578_v6 = vperm.slane %v1574_v18, 0  ;;  %v1579_v5 = vperm.slane %v1574_v18, 1 }
 0x2a3   :  { %v1582_v40 = vadd.f32 %v1578_v6, %v1575_v11  ;;  %v1583_v42 = vadd.f32 %v1579_v5, %v1576_v38 }
 0x2a5   :  { %v1584_v43 = vmax.f32 %v1582_v40, 0.0  ;;  %v1585_v47 = vmax.f32 %v1583_v42, 0.0 }
 0x2a7   :  { %v1586_v48 = vpack.c.bf16 %v1584_v43, %v1584_v43  ;;  %v1587_v16 = vpack.c.bf16 %v1585_v47, %v1585_v47 }
 0x2a9   :  { %1793 = vmatmul.bf16.vlgmr.msra.gmra.mxu2 %v1586_v48  ;;  %1806 = vmatmul.bf16.vlgmr.msra.gmra.mxu3 %v1587_v16 }
 0x2aa   :  { %1819 = vmatmul.bf16.vlgmr.msrb.gmra.mxu0 %v1586_v48  ;;  %1832 = vmatmul.bf16.vlgmr.msrb.gmra.mxu1 %v1587_v16 }
 0x327   :  { %v1820_v26 = vpop.f32.mrf.mxu0  ;;  %v1833_v44 = vpop.f32.mrf.mxu1 }
 0x328   :  { %v1821_v49 = vadd.f32 %v1820_v26, %v1622_v33 }
 0x32a   :  { %v1834_v51 = vadd.f32 %v1833_v44, %v1821_v49 }
 0x32c   :  { %v1838_v52 = vsub.f32 0.0, %v1834_v51  ;;  %v1794_v25 = vpop.f32.mrf.mxu2  ;;  %v1807_v53 = vpop.f32.mrf.mxu3 }
 0x32d   :  { %v1795_v54 = vadd.f32 %v1794_v25, %v1621_v8 }
 0x32e   :  { %v1841_v55 = vmul.f32 1.442695, %v1838_v52 }
 0x32f   :  { %v1808_v56 = vadd.f32 %v1807_v53, %v1795_v54  ;;  %v1822_v57 = vpop.f32.mrf.mxu0  ;;  %v1835_v59 = vpop.f32.mrf.mxu1 }
 0x330   :  { %2780 = vpow2.f32 %v1841_v55 }
 0x331   :  { %v1837_v60 = vsub.f32 0.0, %v1808_v56 }
 0x333   :  { %v1839_v62 = vmul.f32 1.442695, %v1837_v60 }
 0x334   :  { %v1796_v63 = vpop.f32.mrf.mxu2  ;;  %v1809_v9 = vpop.f32.mrf.mxu3 }
 0x335   :  { %2782 = vpow2.f32 %v1839_v62 }
 0x336   :  { %v2781_v0 = vpop.eup %2780 }
 0x337   :  { %v1844_v1 = vadd.f32 1.0, %v2781_v0 }
 0x339   :  { %2784 = vrcp.f32 %v1844_v1 }
 0x33b   :  { %v2783_v2 = vpop.eup %2782 }
 0x33c   :  { %v1843_v3 = vadd.f32 1.0, %v2783_v2 }
 0x33e   :  { %2786 = vrcp.f32 %v1843_v3 }
 0x33f   :  { %v2785_v4 = vpop.eup %2784 }
 0x340   :  { %v1848_v41 = vmax.f32 %v2785_v4, 0.0 }
 0x342   :  { %v1850_v34 = vmin.f32 %v1848_v41, 1.0 }
 0x344   :  { %v2787_v50 = vpop.eup %2786  ;;  %1852 = vst [vmem:[#allocation13 + $0x8] sm:$0xff] %v1850_v34 }
 0x345   :  { %v1847_v7 = vmax.f32 %v2787_v50, 0.0 }
 0x347   :  { %v1849_v10 = vmin.f32 %v1847_v7, 1.0 }
 0x349   :  { %1851 = vst [vmem:[#allocation13] sm:$0xff] %v1849_v10 }
 0x34a   :  { %1863 = dma.vmem_to_hbm [thread:$0]  %s1859_s5, 256, %s1861_s29, [#allocation4]  }
 0x34b   :  { %2964 = dma.done.wait [#allocation4], 256  }
 0x34c   :  { %2965 = vsyncadd [#allocation4], 4294967040 }
 0x34d   :  { %1868 = vsyncpa [#allocation3], 1 }
 0x34e   :  { %1869 = vsyncpa [#allocation6], 1 }
 0x34f   :  { %1870 = vsyncpa [#allocation9], 1 }
 0x350   :  { %1871 = vsyncpa [#allocation12], 1 }
 0x351   :  { %1872 = vsyncpa [#allocation4], 1 }

</bundles_post_ra>
